<compile_context>
chip_gen: v7x
topology: tpu7x:2x2x1
jax: 0.10.0
libtpu: 0.0.40
codegen_flags: <defaults>
</compile_context>

<pallas_src>
import functools

import jax
import jax.numpy as jnp
from jax.experimental import pallas as pl
from jax.experimental.pallas import tpu as pltpu


def _round_up(x, m):
    return ((x + m - 1) // m) * m


def _tspnet_kernel(feats_ref, adj_ref,
                   w1_ref, b1_ref, w2_ref, b2_ref,
                   wf1_ref, bf1_ref, wf2_ref, bf2_ref,
                   wh_ref, bh_ref,
                   out_ref, *, num_nodes, action_size):
    n = num_nodes
    bt = feats_ref.shape[0]
    hdim = w2_ref.shape[0]                                    # 128

    feats = feats_ref[...]                                    # (bt, N*F)
    adj = adj_ref[...]                                        # (bt, N*N)

    # Normalized adjacency coefficients, kept as (bt, 1) columns:
    #   coef[i][j] = adj[b, i, j] / (deg_i + 1e-6)
    # (normalize the adjacency once; reciprocal is exact for the 1e-5 check).
    coef = []
    for i in range(n):
        row = adj[:, i * n:(i + 1) * n]                       # (bt, N)
        deg = jnp.sum(row, axis=1, keepdims=True) + 1e-6      # (bt, 1)
        inv = pl.reciprocal(deg, approx=False)
        coef.append([row[:, j:j + 1] * inv for j in range(n)])

    def aggregate(node_vals):
        # node_vals: list of N lane-dense (bt, H) per-node values.
        # agg_i = sum_j coef[i][j] * node_vals[j]  -- unrolled VPU MAC, runs
        # in the VALU/XLU slots concurrently with the MXU matmuls.
        out = []
        for i in range(n):
            acc = coef[i][0] * node_vals[0]
            for j in range(1, n):
                acc = acc + coef[i][j] * node_vals[j]
            out.append(acc)
        return out

    # ---- graph conv 1 (reassociated: x @ W1 first, then aggregate) --------
    # w1_ref is the block-diagonal (N*F, N*H) expansion of gc1's (F, H)
    # weight: one lane-dense MXU matmul yields every node's x @ W1, and the
    # per-node blocks are free 128-aligned lane slices.
    xw1_all = jnp.dot(feats, w1_ref[...],
                      preferred_element_type=jnp.float32)     # (bt, N*H)
    xw1 = [xw1_all[:, j * hdim:(j + 1) * hdim] for j in range(n)]
    b1 = b1_ref[...]
    h1 = [jnp.maximum(a + b1, 0.0) for a in aggregate(xw1)]
    # TODO(synk): dropout skipped (eval mode / training=False).

    # ---- graph conv 2 (one big (N*bt, H) weight matmul, then aggregate) ----
    h1_cat = jnp.concatenate(h1, axis=0)                      # (N*bt, H)
    xw2_all = jnp.dot(h1_cat, w2_ref[...],
                      preferred_element_type=jnp.float32)     # (N*bt, H)
    xw2 = [xw2_all[j * bt:(j + 1) * bt, :] for j in range(n)]
    b2 = b2_ref[...]
    h2 = [jnp.maximum(a + b2, 0.0) for a in aggregate(xw2)]

    # ---- mean over nodes (PyTorch dim=1) ----
    g = h2[0]
    for i in range(1, n):
        g = g + h2[i]
    g = g * (1.0 / n)                                         # (bt, H)

    # ---- MLP head on (bt, .) matrices ----
    f1 = jnp.maximum(
        jnp.dot(g, wf1_ref[...], preferred_element_type=jnp.float32)
        + bf1_ref[...], 0.0)
    f2 = jnp.maximum(
        jnp.dot(f1, wf2_ref[...], preferred_element_type=jnp.float32)
        + bf2_ref[...], 0.0)

    # ---- fused lane-dense policy/value head ----
    # wh columns: [0:A] = fc_pi, [A] = fc_v, rest zero.
    head = jnp.dot(f2, wh_ref[...],
                   preferred_element_type=jnp.float32) + bh_ref[...]
    lane = jax.lax.broadcasted_iota(jnp.int32, head.shape, 1)
    is_pi = lane < action_size
    m = jnp.max(jnp.where(is_pi, head, -jnp.inf), axis=-1, keepdims=True)
    e = jnp.exp(jnp.where(is_pi, head - m, -jnp.inf))
    denom = jnp.sum(e, axis=-1, keepdims=True)
    pi = e * pl.reciprocal(denom, approx=False)
    # lanes [0:A] = softmax(pi logits), lane A = v, rest 0 -> one full store.
    out_ref[...] = jnp.where(is_pi, pi,
                             jnp.where(lane == action_size, head, 0.0))


def tspnet_forward(node_features, adjacency_matrix, params, *, batch_tile=256):
    B, N, F = node_features.shape
    H = params["w2"].shape[0]
    A = params["wpi"].shape[1]

    out_w = max(128, _round_up(A + 1, 128))

    # Fuse the two tiny heads into one lane-dense (H, out_w) weight + bias.
    w_head = jnp.zeros((H, out_w), jnp.float32)
    w_head = w_head.at[:, :A].set(params["wpi"])
    w_head = w_head.at[:, A:A + 1].set(params["wv"])
    b_head = jnp.zeros((1, out_w), jnp.float32)
    b_head = b_head.at[:, :A].set(params["bpi"])
    b_head = b_head.at[:, A:A + 1].set(params["bv"])

    # Block-diagonal gc1 weight: (N*F, N*H), block i = params["w1"].
    w1_blk = jnp.zeros((N * F, N * H), jnp.float32)
    for i in range(N):
        w1_blk = w1_blk.at[i * F:(i + 1) * F, i * H:(i + 1) * H].set(params["w1"])

    # Flatten trailing dims -> contiguous, lane-dense 2-D input blocks.
    feats_flat = node_features.reshape(B, N * F)
    adj_flat = adjacency_matrix.reshape(B, N * N)

    # Batch tiling: bt multiple of 8; keep >=2 grid steps when the batch
    # allows so v7x can shard the "parallel" axis across its 2 TensorCores.
    b8 = _round_up(B, 8)
    bt = min(_round_up(batch_tile, 8), b8)
    if b8 // bt < 2 and b8 >= 16:
        bt = _round_up(pl.cdiv(b8, 2), 8)
    b_pad = _round_up(b8, bt)
    if b_pad != B:
        feats_flat = jnp.pad(feats_flat, ((0, b_pad - B), (0, 0)))
        adj_flat = jnp.pad(adj_flat, ((0, b_pad - B), (0, 0)))

    weights = [w1_blk, params["b1"], params["w2"], params["b2"],
               params["wf1"], params["bf1"], params["wf2"], params["bf2"],
               w_head, b_head]
    # Weights: whole-array resident VMEM refs (no per-step double buffering).
    weight_specs = [pl.BlockSpec(memory_space=pltpu.MemorySpace.VMEM)
                    for _ in weights]

    out = pl.pallas_call(
        functools.partial(_tspnet_kernel, num_nodes=N, action_size=A),
        out_shape=jax.ShapeDtypeStruct((b_pad, out_w), jnp.float32),
        grid_spec=pltpu.PrefetchScalarGridSpec(
            num_scalar_prefetch=0,
            grid=(b_pad // bt,),
            in_specs=[pl.BlockSpec((bt, N * F), lambda b: (b, 0)),
                      pl.BlockSpec((bt, N * N), lambda b: (b, 0))]
                     + weight_specs,
            out_specs=pl.BlockSpec((bt, out_w), lambda b: (b, 0)),
        ),
        compiler_params=pltpu.CompilerParams(
            dimension_semantics=("parallel",),
            vmem_limit_bytes=48 * 1024 * 1024),
    )(feats_flat, adj_flat, *weights)

    pi = out[:B, :A]
    v = out[:B, A:A + 1]
    return pi, v


def init_params(key, node_feature_size=4, hidden_dim=128, action_size=8):
    """Deterministic PyTorch-Linear-style init; weights stored as (in, out)."""
    def linear(k, fan_in, fan_out):
        kw, kb = jax.random.split(k)
        bound = 1.0 / jnp.sqrt(fan_in)
        w = jax.random.uniform(kw, (fan_in, fan_out), jnp.float32, -bound, bound)
        b = jax.random.uniform(kb, (1, fan_out), jnp.float32, -bound, bound)
        return w, b

    keys = jax.random.split(key, 6)
    p = {}
    p["w1"], p["b1"] = linear(keys[0], node_feature_size, hidden_dim)
    p["w2"], p["b2"] = linear(keys[1], hidden_dim, hidden_dim)
    p["wf1"], p["bf1"] = linear(keys[2], hidden_dim, 256)
    p["wf2"], p["bf2"] = linear(keys[3], 256, 128)
    p["wpi"], p["bpi"] = linear(keys[4], 128, action_size)
    p["wv"], p["bv"] = linear(keys[5], 128, 1)
    return p


def reference_forward(node_features, adjacency_matrix, params):
    """Pure-JAX reference mirroring the PyTorch module (eval mode)."""
    def gconv(x, adj, w, b):
        deg = adj.sum(-1, keepdims=True) + 1e-6
        norm = adj / deg
        return jnp.einsum("bij,bjf->bif", norm, x) @ w + b

    x = jax.nn.relu(gconv(node_features, adjacency_matrix,
                          params["w1"], params["b1"]))
    x = jax.nn.relu(gconv(x, adjacency_matrix, params["w2"], params["b2"]))
    x = x.mean(axis=1)
    x = jax.nn.relu(x @ params["wf1"] + params["bf1"])
    x = jax.nn.relu(x @ params["wf2"] + params["bf2"])
    pi = jax.nn.softmax(x @ params["wpi"] + params["bpi"], axis=1)
    v = x @ params["wv"] + params["bv"]
    return pi, v


if __name__ == "__main__":
    B, N, F = 2, 8, 4          # batch, num_nodes, node_feature_size
    A = N                       # action_size == num_nodes for TSP

    key = jax.random.PRNGKey(0)
    k_params, k_feat, k_adj = jax.random.split(key, 3)

    params = init_params(k_params, node_feature_size=F, hidden_dim=128,
                         action_size=A)

    node_features = jax.random.normal(k_feat, (B, N, F), jnp.float32)
    adj = (jax.random.uniform(k_adj, (B, N, N)) > 0.5).astype(jnp.float32)
    adj = jnp.maximum(adj, jnp.transpose(adj, (0, 2, 1)))   # symmetric adjacency

    pi, v = tspnet_forward(node_features, adj, params)
    pi, v = jax.block_until_ready((pi, v))

    pi_ref, v_ref = reference_forward(node_features, adj, params)
    assert pi.shape == (B, A) and v.shape == (B, 1)
    assert jnp.allclose(pi, pi_ref, atol=1e-5, rtol=1e-5)
    assert jnp.allclose(v, v_ref, atol=1e-5, rtol=1e-5)

    print("KERNEL_OK")
</pallas_src>

<mosaic_0001>
module attributes {stable_mosaic.version = 11 : i64} {
  func.func @_tspnet_kernel(%arg0: i32, %arg1: memref<8x32xf32, #tpu.memory_space<vmem>>, %arg2: memref<8x64xf32, #tpu.memory_space<vmem>>, %arg3: memref<32x1024xf32, #tpu.memory_space<vmem>>, %arg4: memref<1x128xf32, #tpu.memory_space<vmem>>, %arg5: memref<128x128xf32, #tpu.memory_space<vmem>>, %arg6: memref<1x128xf32, #tpu.memory_space<vmem>>, %arg7: memref<128x256xf32, #tpu.memory_space<vmem>>, %arg8: memref<1x256xf32, #tpu.memory_space<vmem>>, %arg9: memref<256x128xf32, #tpu.memory_space<vmem>>, %arg10: memref<1x128xf32, #tpu.memory_space<vmem>>, %arg11: memref<128x128xf32, #tpu.memory_space<vmem>>, %arg12: memref<1x128xf32, #tpu.memory_space<vmem>>, %arg13: memref<8x128xf32, #tpu.memory_space<vmem>>) attributes {dimension_semantics = [#tpu.dimension_semantics<parallel>], iteration_bounds = array<i64: 1>, scalar_prefetch = 0 : i64, scratch_operands = 0 : i64, tpu.core_type = #tpu.core_type<tc>, window_params = [{transform_indices = @transform_0, window_bounds = array<i64: 8, 32>}, {transform_indices = @transform_1, window_bounds = array<i64: 8, 64>}, {pipeline_mode = #tpu.pipeline_mode<synchronous>, transform_indices = @transform_2, window_bounds = array<i64: 32, 1024>}, {pipeline_mode = #tpu.pipeline_mode<synchronous>, transform_indices = @transform_3, window_bounds = array<i64: 1, 128>}, {pipeline_mode = #tpu.pipeline_mode<synchronous>, transform_indices = @transform_4, window_bounds = array<i64: 128, 128>}, {pipeline_mode = #tpu.pipeline_mode<synchronous>, transform_indices = @transform_5, window_bounds = array<i64: 1, 128>}, {pipeline_mode = #tpu.pipeline_mode<synchronous>, transform_indices = @transform_6, window_bounds = array<i64: 128, 256>}, {pipeline_mode = #tpu.pipeline_mode<synchronous>, transform_indices = @transform_7, window_bounds = array<i64: 1, 256>}, {pipeline_mode = #tpu.pipeline_mode<synchronous>, transform_indices = @transform_8, window_bounds = array<i64: 256, 128>}, {pipeline_mode = #tpu.pipeline_mode<synchronous>, transform_indices = @transform_9, window_bounds = array<i64: 1, 128>}, {pipeline_mode = #tpu.pipeline_mode<synchronous>, transform_indices = @transform_10, window_bounds = array<i64: 128, 128>}, {pipeline_mode = #tpu.pipeline_mode<synchronous>, transform_indices = @transform_11, window_bounds = array<i64: 1, 128>}, {transform_indices = @transform_12, window_bounds = array<i64: 8, 128>}]} {
    %c0 = arith.constant 0 : index
    %c0_0 = arith.constant 0 : index
    %0 = vector.load %arg1[%c0, %c0_0] : memref<8x32xf32, #tpu.memory_space<vmem>>, vector<8x32xf32>
    %c0_1 = arith.constant 0 : index
    %c0_2 = arith.constant 0 : index
    %1 = vector.load %arg2[%c0_1, %c0_2] : memref<8x64xf32, #tpu.memory_space<vmem>>, vector<8x64xf32>
    %2 = vector.extract_strided_slice %1 {offsets = [0, 0], sizes = [8, 8], strides = [1, 1]} : vector<8x64xf32> to vector<8x8xf32>
    %cst = arith.constant dense<0.000000e+00> : vector<8xf32>
    %3 = vector.multi_reduction <add>, %2, %cst [1] : vector<8x8xf32> to vector<8xf32>
    %4 = vector.shape_cast %3 : vector<8xf32> to vector<8x1xf32>
    %cst_3 = arith.constant 9.99999997E-7 : f32
    %5 = vector.broadcast %cst_3 : f32 to vector<8x1xf32>
    %6 = arith.addf %4, %5 : vector<8x1xf32>
    %7 = tpu.reciprocal %6 : vector<8x1xf32> -> vector<8x1xf32>
    %8 = vector.extract_strided_slice %2 {offsets = [0, 0], sizes = [8, 1], strides = [1, 1]} : vector<8x8xf32> to vector<8x1xf32>
    %9 = arith.mulf %8, %7 : vector<8x1xf32>
    %10 = vector.extract_strided_slice %2 {offsets = [0, 1], sizes = [8, 1], strides = [1, 1]} : vector<8x8xf32> to vector<8x1xf32>
    %11 = arith.mulf %10, %7 : vector<8x1xf32>
    %12 = vector.extract_strided_slice %2 {offsets = [0, 2], sizes = [8, 1], strides = [1, 1]} : vector<8x8xf32> to vector<8x1xf32>
    %13 = arith.mulf %12, %7 : vector<8x1xf32>
    %14 = vector.extract_strided_slice %2 {offsets = [0, 3], sizes = [8, 1], strides = [1, 1]} : vector<8x8xf32> to vector<8x1xf32>
    %15 = arith.mulf %14, %7 : vector<8x1xf32>
    %16 = vector.extract_strided_slice %2 {offsets = [0, 4], sizes = [8, 1], strides = [1, 1]} : vector<8x8xf32> to vector<8x1xf32>
    %17 = arith.mulf %16, %7 : vector<8x1xf32>
    %18 = vector.extract_strided_slice %2 {offsets = [0, 5], sizes = [8, 1], strides = [1, 1]} : vector<8x8xf32> to vector<8x1xf32>
    %19 = arith.mulf %18, %7 : vector<8x1xf32>
    %20 = vector.extract_strided_slice %2 {offsets = [0, 6], sizes = [8, 1], strides = [1, 1]} : vector<8x8xf32> to vector<8x1xf32>
    %21 = arith.mulf %20, %7 : vector<8x1xf32>
    %22 = vector.extract_strided_slice %2 {offsets = [0, 7], sizes = [8, 1], strides = [1, 1]} : vector<8x8xf32> to vector<8x1xf32>
    %23 = arith.mulf %22, %7 : vector<8x1xf32>
    %24 = vector.extract_strided_slice %1 {offsets = [0, 8], sizes = [8, 8], strides = [1, 1]} : vector<8x64xf32> to vector<8x8xf32>
    %cst_4 = arith.constant dense<0.000000e+00> : vector<8xf32>
    %25 = vector.multi_reduction <add>, %24, %cst_4 [1] : vector<8x8xf32> to vector<8xf32>
    %26 = vector.shape_cast %25 : vector<8xf32> to vector<8x1xf32>
    %cst_5 = arith.constant 9.99999997E-7 : f32
    %27 = vector.broadcast %cst_5 : f32 to vector<8x1xf32>
    %28 = arith.addf %26, %27 : vector<8x1xf32>
    %29 = tpu.reciprocal %28 : vector<8x1xf32> -> vector<8x1xf32>
    %30 = vector.extract_strided_slice %24 {offsets = [0, 0], sizes = [8, 1], strides = [1, 1]} : vector<8x8xf32> to vector<8x1xf32>
    %31 = arith.mulf %30, %29 : vector<8x1xf32>
    %32 = vector.extract_strided_slice %24 {offsets = [0, 1], sizes = [8, 1], strides = [1, 1]} : vector<8x8xf32> to vector<8x1xf32>
    %33 = arith.mulf %32, %29 : vector<8x1xf32>
    %34 = vector.extract_strided_slice %24 {offsets = [0, 2], sizes = [8, 1], strides = [1, 1]} : vector<8x8xf32> to vector<8x1xf32>
    %35 = arith.mulf %34, %29 : vector<8x1xf32>
    %36 = vector.extract_strided_slice %24 {offsets = [0, 3], sizes = [8, 1], strides = [1, 1]} : vector<8x8xf32> to vector<8x1xf32>
    %37 = arith.mulf %36, %29 : vector<8x1xf32>
    %38 = vector.extract_strided_slice %24 {offsets = [0, 4], sizes = [8, 1], strides = [1, 1]} : vector<8x8xf32> to vector<8x1xf32>
    %39 = arith.mulf %38, %29 : vector<8x1xf32>
    %40 = vector.extract_strided_slice %24 {offsets = [0, 5], sizes = [8, 1], strides = [1, 1]} : vector<8x8xf32> to vector<8x1xf32>
    %41 = arith.mulf %40, %29 : vector<8x1xf32>
    %42 = vector.extract_strided_slice %24 {offsets = [0, 6], sizes = [8, 1], strides = [1, 1]} : vector<8x8xf32> to vector<8x1xf32>
    %43 = arith.mulf %42, %29 : vector<8x1xf32>
    %44 = vector.extract_strided_slice %24 {offsets = [0, 7], sizes = [8, 1], strides = [1, 1]} : vector<8x8xf32> to vector<8x1xf32>
    %45 = arith.mulf %44, %29 : vector<8x1xf32>
    %46 = vector.extract_strided_slice %1 {offsets = [0, 16], sizes = [8, 8], strides = [1, 1]} : vector<8x64xf32> to vector<8x8xf32>
    %cst_6 = arith.constant dense<0.000000e+00> : vector<8xf32>
    %47 = vector.multi_reduction <add>, %46, %cst_6 [1] : vector<8x8xf32> to vector<8xf32>
    %48 = vector.shape_cast %47 : vector<8xf32> to vector<8x1xf32>
    %cst_7 = arith.constant 9.99999997E-7 : f32
    %49 = vector.broadcast %cst_7 : f32 to vector<8x1xf32>
    %50 = arith.addf %48, %49 : vector<8x1xf32>
    %51 = tpu.reciprocal %50 : vector<8x1xf32> -> vector<8x1xf32>
    %52 = vector.extract_strided_slice %46 {offsets = [0, 0], sizes = [8, 1], strides = [1, 1]} : vector<8x8xf32> to vector<8x1xf32>
    %53 = arith.mulf %52, %51 : vector<8x1xf32>
    %54 = vector.extract_strided_slice %46 {offsets = [0, 1], sizes = [8, 1], strides = [1, 1]} : vector<8x8xf32> to vector<8x1xf32>
    %55 = arith.mulf %54, %51 : vector<8x1xf32>
    %56 = vector.extract_strided_slice %46 {offsets = [0, 2], sizes = [8, 1], strides = [1, 1]} : vector<8x8xf32> to vector<8x1xf32>
    %57 = arith.mulf %56, %51 : vector<8x1xf32>
    %58 = vector.extract_strided_slice %46 {offsets = [0, 3], sizes = [8, 1], strides = [1, 1]} : vector<8x8xf32> to vector<8x1xf32>
    %59 = arith.mulf %58, %51 : vector<8x1xf32>
    %60 = vector.extract_strided_slice %46 {offsets = [0, 4], sizes = [8, 1], strides = [1, 1]} : vector<8x8xf32> to vector<8x1xf32>
    %61 = arith.mulf %60, %51 : vector<8x1xf32>
    %62 = vector.extract_strided_slice %46 {offsets = [0, 5], sizes = [8, 1], strides = [1, 1]} : vector<8x8xf32> to vector<8x1xf32>
    %63 = arith.mulf %62, %51 : vector<8x1xf32>
    %64 = vector.extract_strided_slice %46 {offsets = [0, 6], sizes = [8, 1], strides = [1, 1]} : vector<8x8xf32> to vector<8x1xf32>
    %65 = arith.mulf %64, %51 : vector<8x1xf32>
    %66 = vector.extract_strided_slice %46 {offsets = [0, 7], sizes = [8, 1], strides = [1, 1]} : vector<8x8xf32> to vector<8x1xf32>
    %67 = arith.mulf %66, %51 : vector<8x1xf32>
    %68 = vector.extract_strided_slice %1 {offsets = [0, 24], sizes = [8, 8], strides = [1, 1]} : vector<8x64xf32> to vector<8x8xf32>
    %cst_8 = arith.constant dense<0.000000e+00> : vector<8xf32>
    %69 = vector.multi_reduction <add>, %68, %cst_8 [1] : vector<8x8xf32> to vector<8xf32>
    %70 = vector.shape_cast %69 : vector<8xf32> to vector<8x1xf32>
    %cst_9 = arith.constant 9.99999997E-7 : f32
    %71 = vector.broadcast %cst_9 : f32 to vector<8x1xf32>
    %72 = arith.addf %70, %71 : vector<8x1xf32>
    %73 = tpu.reciprocal %72 : vector<8x1xf32> -> vector<8x1xf32>
    %74 = vector.extract_strided_slice %68 {offsets = [0, 0], sizes = [8, 1], strides = [1, 1]} : vector<8x8xf32> to vector<8x1xf32>
    %75 = arith.mulf %74, %73 : vector<8x1xf32>
    %76 = vector.extract_strided_slice %68 {offsets = [0, 1], sizes = [8, 1], strides = [1, 1]} : vector<8x8xf32> to vector<8x1xf32>
    %77 = arith.mulf %76, %73 : vector<8x1xf32>
    %78 = vector.extract_strided_slice %68 {offsets = [0, 2], sizes = [8, 1], strides = [1, 1]} : vector<8x8xf32> to vector<8x1xf32>
    %79 = arith.mulf %78, %73 : vector<8x1xf32>
    %80 = vector.extract_strided_slice %68 {offsets = [0, 3], sizes = [8, 1], strides = [1, 1]} : vector<8x8xf32> to vector<8x1xf32>
    %81 = arith.mulf %80, %73 : vector<8x1xf32>
    %82 = vector.extract_strided_slice %68 {offsets = [0, 4], sizes = [8, 1], strides = [1, 1]} : vector<8x8xf32> to vector<8x1xf32>
    %83 = arith.mulf %82, %73 : vector<8x1xf32>
    %84 = vector.extract_strided_slice %68 {offsets = [0, 5], sizes = [8, 1], strides = [1, 1]} : vector<8x8xf32> to vector<8x1xf32>
    %85 = arith.mulf %84, %73 : vector<8x1xf32>
    %86 = vector.extract_strided_slice %68 {offsets = [0, 6], sizes = [8, 1], strides = [1, 1]} : vector<8x8xf32> to vector<8x1xf32>
    %87 = arith.mulf %86, %73 : vector<8x1xf32>
    %88 = vector.extract_strided_slice %68 {offsets = [0, 7], sizes = [8, 1], strides = [1, 1]} : vector<8x8xf32> to vector<8x1xf32>
    %89 = arith.mulf %88, %73 : vector<8x1xf32>
    %90 = vector.extract_strided_slice %1 {offsets = [0, 32], sizes = [8, 8], strides = [1, 1]} : vector<8x64xf32> to vector<8x8xf32>
    %cst_10 = arith.constant dense<0.000000e+00> : vector<8xf32>
    %91 = vector.multi_reduction <add>, %90, %cst_10 [1] : vector<8x8xf32> to vector<8xf32>
    %92 = vector.shape_cast %91 : vector<8xf32> to vector<8x1xf32>
    %cst_11 = arith.constant 9.99999997E-7 : f32
    %93 = vector.broadcast %cst_11 : f32 to vector<8x1xf32>
    %94 = arith.addf %92, %93 : vector<8x1xf32>
    %95 = tpu.reciprocal %94 : vector<8x1xf32> -> vector<8x1xf32>
    %96 = vector.extract_strided_slice %90 {offsets = [0, 0], sizes = [8, 1], strides = [1, 1]} : vector<8x8xf32> to vector<8x1xf32>
    %97 = arith.mulf %96, %95 : vector<8x1xf32>
    %98 = vector.extract_strided_slice %90 {offsets = [0, 1], sizes = [8, 1], strides = [1, 1]} : vector<8x8xf32> to vector<8x1xf32>
    %99 = arith.mulf %98, %95 : vector<8x1xf32>
    %100 = vector.extract_strided_slice %90 {offsets = [0, 2], sizes = [8, 1], strides = [1, 1]} : vector<8x8xf32> to vector<8x1xf32>
    %101 = arith.mulf %100, %95 : vector<8x1xf32>
    %102 = vector.extract_strided_slice %90 {offsets = [0, 3], sizes = [8, 1], strides = [1, 1]} : vector<8x8xf32> to vector<8x1xf32>
    %103 = arith.mulf %102, %95 : vector<8x1xf32>
    %104 = vector.extract_strided_slice %90 {offsets = [0, 4], sizes = [8, 1], strides = [1, 1]} : vector<8x8xf32> to vector<8x1xf32>
    %105 = arith.mulf %104, %95 : vector<8x1xf32>
    %106 = vector.extract_strided_slice %90 {offsets = [0, 5], sizes = [8, 1], strides = [1, 1]} : vector<8x8xf32> to vector<8x1xf32>
    %107 = arith.mulf %106, %95 : vector<8x1xf32>
    %108 = vector.extract_strided_slice %90 {offsets = [0, 6], sizes = [8, 1], strides = [1, 1]} : vector<8x8xf32> to vector<8x1xf32>
    %109 = arith.mulf %108, %95 : vector<8x1xf32>
    %110 = vector.extract_strided_slice %90 {offsets = [0, 7], sizes = [8, 1], strides = [1, 1]} : vector<8x8xf32> to vector<8x1xf32>
    %111 = arith.mulf %110, %95 : vector<8x1xf32>
    %112 = vector.extract_strided_slice %1 {offsets = [0, 40], sizes = [8, 8], strides = [1, 1]} : vector<8x64xf32> to vector<8x8xf32>
    %cst_12 = arith.constant dense<0.000000e+00> : vector<8xf32>
    %113 = vector.multi_reduction <add>, %112, %cst_12 [1] : vector<8x8xf32> to vector<8xf32>
    %114 = vector.shape_cast %113 : vector<8xf32> to vector<8x1xf32>
    %cst_13 = arith.constant 9.99999997E-7 : f32
    %115 = vector.broadcast %cst_13 : f32 to vector<8x1xf32>
    %116 = arith.addf %114, %115 : vector<8x1xf32>
    %117 = tpu.reciprocal %116 : vector<8x1xf32> -> vector<8x1xf32>
    %118 = vector.extract_strided_slice %112 {offsets = [0, 0], sizes = [8, 1], strides = [1, 1]} : vector<8x8xf32> to vector<8x1xf32>
    %119 = arith.mulf %118, %117 : vector<8x1xf32>
    %120 = vector.extract_strided_slice %112 {offsets = [0, 1], sizes = [8, 1], strides = [1, 1]} : vector<8x8xf32> to vector<8x1xf32>
    %121 = arith.mulf %120, %117 : vector<8x1xf32>
    %122 = vector.extract_strided_slice %112 {offsets = [0, 2], sizes = [8, 1], strides = [1, 1]} : vector<8x8xf32> to vector<8x1xf32>
    %123 = arith.mulf %122, %117 : vector<8x1xf32>
    %124 = vector.extract_strided_slice %112 {offsets = [0, 3], sizes = [8, 1], strides = [1, 1]} : vector<8x8xf32> to vector<8x1xf32>
    %125 = arith.mulf %124, %117 : vector<8x1xf32>
    %126 = vector.extract_strided_slice %112 {offsets = [0, 4], sizes = [8, 1], strides = [1, 1]} : vector<8x8xf32> to vector<8x1xf32>
    %127 = arith.mulf %126, %117 : vector<8x1xf32>
    %128 = vector.extract_strided_slice %112 {offsets = [0, 5], sizes = [8, 1], strides = [1, 1]} : vector<8x8xf32> to vector<8x1xf32>
    %129 = arith.mulf %128, %117 : vector<8x1xf32>
    %130 = vector.extract_strided_slice %112 {offsets = [0, 6], sizes = [8, 1], strides = [1, 1]} : vector<8x8xf32> to vector<8x1xf32>
    %131 = arith.mulf %130, %117 : vector<8x1xf32>
    %132 = vector.extract_strided_slice %112 {offsets = [0, 7], sizes = [8, 1], strides = [1, 1]} : vector<8x8xf32> to vector<8x1xf32>
    %133 = arith.mulf %132, %117 : vector<8x1xf32>
    %134 = vector.extract_strided_slice %1 {offsets = [0, 48], sizes = [8, 8], strides = [1, 1]} : vector<8x64xf32> to vector<8x8xf32>
    %cst_14 = arith.constant dense<0.000000e+00> : vector<8xf32>
    %135 = vector.multi_reduction <add>, %134, %cst_14 [1] : vector<8x8xf32> to vector<8xf32>
    %136 = vector.shape_cast %135 : vector<8xf32> to vector<8x1xf32>
    %cst_15 = arith.constant 9.99999997E-7 : f32
    %137 = vector.broadcast %cst_15 : f32 to vector<8x1xf32>
    %138 = arith.addf %136, %137 : vector<8x1xf32>
    %139 = tpu.reciprocal %138 : vector<8x1xf32> -> vector<8x1xf32>
    %140 = vector.extract_strided_slice %134 {offsets = [0, 0], sizes = [8, 1], strides = [1, 1]} : vector<8x8xf32> to vector<8x1xf32>
    %141 = arith.mulf %140, %139 : vector<8x1xf32>
    %142 = vector.extract_strided_slice %134 {offsets = [0, 1], sizes = [8, 1], strides = [1, 1]} : vector<8x8xf32> to vector<8x1xf32>
    %143 = arith.mulf %142, %139 : vector<8x1xf32>
    %144 = vector.extract_strided_slice %134 {offsets = [0, 2], sizes = [8, 1], strides = [1, 1]} : vector<8x8xf32> to vector<8x1xf32>
    %145 = arith.mulf %144, %139 : vector<8x1xf32>
    %146 = vector.extract_strided_slice %134 {offsets = [0, 3], sizes = [8, 1], strides = [1, 1]} : vector<8x8xf32> to vector<8x1xf32>
    %147 = arith.mulf %146, %139 : vector<8x1xf32>
    %148 = vector.extract_strided_slice %134 {offsets = [0, 4], sizes = [8, 1], strides = [1, 1]} : vector<8x8xf32> to vector<8x1xf32>
    %149 = arith.mulf %148, %139 : vector<8x1xf32>
    %150 = vector.extract_strided_slice %134 {offsets = [0, 5], sizes = [8, 1], strides = [1, 1]} : vector<8x8xf32> to vector<8x1xf32>
    %151 = arith.mulf %150, %139 : vector<8x1xf32>
    %152 = vector.extract_strided_slice %134 {offsets = [0, 6], sizes = [8, 1], strides = [1, 1]} : vector<8x8xf32> to vector<8x1xf32>
    %153 = arith.mulf %152, %139 : vector<8x1xf32>
    %154 = vector.extract_strided_slice %134 {offsets = [0, 7], sizes = [8, 1], strides = [1, 1]} : vector<8x8xf32> to vector<8x1xf32>
    %155 = arith.mulf %154, %139 : vector<8x1xf32>
    %156 = vector.extract_strided_slice %1 {offsets = [0, 56], sizes = [8, 8], strides = [1, 1]} : vector<8x64xf32> to vector<8x8xf32>
    %cst_16 = arith.constant dense<0.000000e+00> : vector<8xf32>
    %157 = vector.multi_reduction <add>, %156, %cst_16 [1] : vector<8x8xf32> to vector<8xf32>
    %158 = vector.shape_cast %157 : vector<8xf32> to vector<8x1xf32>
    %cst_17 = arith.constant 9.99999997E-7 : f32
    %159 = vector.broadcast %cst_17 : f32 to vector<8x1xf32>
    %160 = arith.addf %158, %159 : vector<8x1xf32>
    %161 = tpu.reciprocal %160 : vector<8x1xf32> -> vector<8x1xf32>
    %162 = vector.extract_strided_slice %156 {offsets = [0, 0], sizes = [8, 1], strides = [1, 1]} : vector<8x8xf32> to vector<8x1xf32>
    %163 = arith.mulf %162, %161 : vector<8x1xf32>
    %164 = vector.extract_strided_slice %156 {offsets = [0, 1], sizes = [8, 1], strides = [1, 1]} : vector<8x8xf32> to vector<8x1xf32>
    %165 = arith.mulf %164, %161 : vector<8x1xf32>
    %166 = vector.extract_strided_slice %156 {offsets = [0, 2], sizes = [8, 1], strides = [1, 1]} : vector<8x8xf32> to vector<8x1xf32>
    %167 = arith.mulf %166, %161 : vector<8x1xf32>
    %168 = vector.extract_strided_slice %156 {offsets = [0, 3], sizes = [8, 1], strides = [1, 1]} : vector<8x8xf32> to vector<8x1xf32>
    %169 = arith.mulf %168, %161 : vector<8x1xf32>
    %170 = vector.extract_strided_slice %156 {offsets = [0, 4], sizes = [8, 1], strides = [1, 1]} : vector<8x8xf32> to vector<8x1xf32>
    %171 = arith.mulf %170, %161 : vector<8x1xf32>
    %172 = vector.extract_strided_slice %156 {offsets = [0, 5], sizes = [8, 1], strides = [1, 1]} : vector<8x8xf32> to vector<8x1xf32>
    %173 = arith.mulf %172, %161 : vector<8x1xf32>
    %174 = vector.extract_strided_slice %156 {offsets = [0, 6], sizes = [8, 1], strides = [1, 1]} : vector<8x8xf32> to vector<8x1xf32>
    %175 = arith.mulf %174, %161 : vector<8x1xf32>
    %176 = vector.extract_strided_slice %156 {offsets = [0, 7], sizes = [8, 1], strides = [1, 1]} : vector<8x8xf32> to vector<8x1xf32>
    %177 = arith.mulf %176, %161 : vector<8x1xf32>
    %c0_18 = arith.constant 0 : index
    %c0_19 = arith.constant 0 : index
    %178 = vector.load %arg3[%c0_18, %c0_19] : memref<32x1024xf32, #tpu.memory_space<vmem>>, vector<32x1024xf32>
    %cst_20 = arith.constant dense<0.000000e+00> : vector<8x1024xf32>
    %179 = tpu.matmul %0, %178, %cst_20 {dimension_numbers = #tpu.dot_dimension_numbers<[1], [0], [0], [1], [0, 0, 1, 1], [], []>} : vector<8x32xf32>, vector<32x1024xf32>, vector<8x1024xf32> -> vector<8x1024xf32>
    %180 = vector.extract_strided_slice %179 {offsets = [0, 0], sizes = [8, 128], strides = [1, 1]} : vector<8x1024xf32> to vector<8x128xf32>
    %181 = vector.extract_strided_slice %179 {offsets = [0, 128], sizes = [8, 128], strides = [1, 1]} : vector<8x1024xf32> to vector<8x128xf32>
    %182 = vector.extract_strided_slice %179 {offsets = [0, 256], sizes = [8, 128], strides = [1, 1]} : vector<8x1024xf32> to vector<8x128xf32>
    %183 = vector.extract_strided_slice %179 {offsets = [0, 384], sizes = [8, 128], strides = [1, 1]} : vector<8x1024xf32> to vector<8x128xf32>
    %184 = vector.extract_strided_slice %179 {offsets = [0, 512], sizes = [8, 128], strides = [1, 1]} : vector<8x1024xf32> to vector<8x128xf32>
    %185 = vector.extract_strided_slice %179 {offsets = [0, 640], sizes = [8, 128], strides = [1, 1]} : vector<8x1024xf32> to vector<8x128xf32>
    %186 = vector.extract_strided_slice %179 {offsets = [0, 768], sizes = [8, 128], strides = [1, 1]} : vector<8x1024xf32> to vector<8x128xf32>
    %187 = vector.extract_strided_slice %179 {offsets = [0, 896], sizes = [8, 128], strides = [1, 1]} : vector<8x1024xf32> to vector<8x128xf32>
    %c0_21 = arith.constant 0 : index
    %c0_22 = arith.constant 0 : index
    %188 = vector.load %arg4[%c0_21, %c0_22] : memref<1x128xf32, #tpu.memory_space<vmem>>, vector<1x128xf32>
    %189 = vector.broadcast %9 : vector<8x1xf32> to vector<8x128xf32>
    %190 = arith.mulf %189, %180 : vector<8x128xf32>
    %191 = vector.broadcast %11 : vector<8x1xf32> to vector<8x128xf32>
    %192 = arith.mulf %191, %181 : vector<8x128xf32>
    %193 = arith.addf %190, %192 : vector<8x128xf32>
    %194 = vector.broadcast %13 : vector<8x1xf32> to vector<8x128xf32>
    %195 = arith.mulf %194, %182 : vector<8x128xf32>
    %196 = arith.addf %193, %195 : vector<8x128xf32>
    %197 = vector.broadcast %15 : vector<8x1xf32> to vector<8x128xf32>
    %198 = arith.mulf %197, %183 : vector<8x128xf32>
    %199 = arith.addf %196, %198 : vector<8x128xf32>
    %200 = vector.broadcast %17 : vector<8x1xf32> to vector<8x128xf32>
    %201 = arith.mulf %200, %184 : vector<8x128xf32>
    %202 = arith.addf %199, %201 : vector<8x128xf32>
    %203 = vector.broadcast %19 : vector<8x1xf32> to vector<8x128xf32>
    %204 = arith.mulf %203, %185 : vector<8x128xf32>
    %205 = arith.addf %202, %204 : vector<8x128xf32>
    %206 = vector.broadcast %21 : vector<8x1xf32> to vector<8x128xf32>
    %207 = arith.mulf %206, %186 : vector<8x128xf32>
    %208 = arith.addf %205, %207 : vector<8x128xf32>
    %209 = vector.broadcast %23 : vector<8x1xf32> to vector<8x128xf32>
    %210 = arith.mulf %209, %187 : vector<8x128xf32>
    %211 = arith.addf %208, %210 : vector<8x128xf32>
    %212 = vector.broadcast %31 : vector<8x1xf32> to vector<8x128xf32>
    %213 = arith.mulf %212, %180 : vector<8x128xf32>
    %214 = vector.broadcast %33 : vector<8x1xf32> to vector<8x128xf32>
    %215 = arith.mulf %214, %181 : vector<8x128xf32>
    %216 = arith.addf %213, %215 : vector<8x128xf32>
    %217 = vector.broadcast %35 : vector<8x1xf32> to vector<8x128xf32>
    %218 = arith.mulf %217, %182 : vector<8x128xf32>
    %219 = arith.addf %216, %218 : vector<8x128xf32>
    %220 = vector.broadcast %37 : vector<8x1xf32> to vector<8x128xf32>
    %221 = arith.mulf %220, %183 : vector<8x128xf32>
    %222 = arith.addf %219, %221 : vector<8x128xf32>
    %223 = vector.broadcast %39 : vector<8x1xf32> to vector<8x128xf32>
    %224 = arith.mulf %223, %184 : vector<8x128xf32>
    %225 = arith.addf %222, %224 : vector<8x128xf32>
    %226 = vector.broadcast %41 : vector<8x1xf32> to vector<8x128xf32>
    %227 = arith.mulf %226, %185 : vector<8x128xf32>
    %228 = arith.addf %225, %227 : vector<8x128xf32>
    %229 = vector.broadcast %43 : vector<8x1xf32> to vector<8x128xf32>
    %230 = arith.mulf %229, %186 : vector<8x128xf32>
    %231 = arith.addf %228, %230 : vector<8x128xf32>
    %232 = vector.broadcast %45 : vector<8x1xf32> to vector<8x128xf32>
    %233 = arith.mulf %232, %187 : vector<8x128xf32>
    %234 = arith.addf %231, %233 : vector<8x128xf32>
    %235 = vector.broadcast %53 : vector<8x1xf32> to vector<8x128xf32>
    %236 = arith.mulf %235, %180 : vector<8x128xf32>
    %237 = vector.broadcast %55 : vector<8x1xf32> to vector<8x128xf32>
    %238 = arith.mulf %237, %181 : vector<8x128xf32>
    %239 = arith.addf %236, %238 : vector<8x128xf32>
    %240 = vector.broadcast %57 : vector<8x1xf32> to vector<8x128xf32>
    %241 = arith.mulf %240, %182 : vector<8x128xf32>
    %242 = arith.addf %239, %241 : vector<8x128xf32>
    %243 = vector.broadcast %59 : vector<8x1xf32> to vector<8x128xf32>
    %244 = arith.mulf %243, %183 : vector<8x128xf32>
    %245 = arith.addf %242, %244 : vector<8x128xf32>
    %246 = vector.broadcast %61 : vector<8x1xf32> to vector<8x128xf32>
    %247 = arith.mulf %246, %184 : vector<8x128xf32>
    %248 = arith.addf %245, %247 : vector<8x128xf32>
    %249 = vector.broadcast %63 : vector<8x1xf32> to vector<8x128xf32>
    %250 = arith.mulf %249, %185 : vector<8x128xf32>
    %251 = arith.addf %248, %250 : vector<8x128xf32>
    %252 = vector.broadcast %65 : vector<8x1xf32> to vector<8x128xf32>
    %253 = arith.mulf %252, %186 : vector<8x128xf32>
    %254 = arith.addf %251, %253 : vector<8x128xf32>
    %255 = vector.broadcast %67 : vector<8x1xf32> to vector<8x128xf32>
    %256 = arith.mulf %255, %187 : vector<8x128xf32>
    %257 = arith.addf %254, %256 : vector<8x128xf32>
    %258 = vector.broadcast %75 : vector<8x1xf32> to vector<8x128xf32>
    %259 = arith.mulf %258, %180 : vector<8x128xf32>
    %260 = vector.broadcast %77 : vector<8x1xf32> to vector<8x128xf32>
    %261 = arith.mulf %260, %181 : vector<8x128xf32>
    %262 = arith.addf %259, %261 : vector<8x128xf32>
    %263 = vector.broadcast %79 : vector<8x1xf32> to vector<8x128xf32>
    %264 = arith.mulf %263, %182 : vector<8x128xf32>
    %265 = arith.addf %262, %264 : vector<8x128xf32>
    %266 = vector.broadcast %81 : vector<8x1xf32> to vector<8x128xf32>
    %267 = arith.mulf %266, %183 : vector<8x128xf32>
    %268 = arith.addf %265, %267 : vector<8x128xf32>
    %269 = vector.broadcast %83 : vector<8x1xf32> to vector<8x128xf32>
    %270 = arith.mulf %269, %184 : vector<8x128xf32>
    %271 = arith.addf %268, %270 : vector<8x128xf32>
    %272 = vector.broadcast %85 : vector<8x1xf32> to vector<8x128xf32>
    %273 = arith.mulf %272, %185 : vector<8x128xf32>
    %274 = arith.addf %271, %273 : vector<8x128xf32>
    %275 = vector.broadcast %87 : vector<8x1xf32> to vector<8x128xf32>
    %276 = arith.mulf %275, %186 : vector<8x128xf32>
    %277 = arith.addf %274, %276 : vector<8x128xf32>
    %278 = vector.broadcast %89 : vector<8x1xf32> to vector<8x128xf32>
    %279 = arith.mulf %278, %187 : vector<8x128xf32>
    %280 = arith.addf %277, %279 : vector<8x128xf32>
    %281 = vector.broadcast %97 : vector<8x1xf32> to vector<8x128xf32>
    %282 = arith.mulf %281, %180 : vector<8x128xf32>
    %283 = vector.broadcast %99 : vector<8x1xf32> to vector<8x128xf32>
    %284 = arith.mulf %283, %181 : vector<8x128xf32>
    %285 = arith.addf %282, %284 : vector<8x128xf32>
    %286 = vector.broadcast %101 : vector<8x1xf32> to vector<8x128xf32>
    %287 = arith.mulf %286, %182 : vector<8x128xf32>
    %288 = arith.addf %285, %287 : vector<8x128xf32>
    %289 = vector.broadcast %103 : vector<8x1xf32> to vector<8x128xf32>
    %290 = arith.mulf %289, %183 : vector<8x128xf32>
    %291 = arith.addf %288, %290 : vector<8x128xf32>
    %292 = vector.broadcast %105 : vector<8x1xf32> to vector<8x128xf32>
    %293 = arith.mulf %292, %184 : vector<8x128xf32>
    %294 = arith.addf %291, %293 : vector<8x128xf32>
    %295 = vector.broadcast %107 : vector<8x1xf32> to vector<8x128xf32>
    %296 = arith.mulf %295, %185 : vector<8x128xf32>
    %297 = arith.addf %294, %296 : vector<8x128xf32>
    %298 = vector.broadcast %109 : vector<8x1xf32> to vector<8x128xf32>
    %299 = arith.mulf %298, %186 : vector<8x128xf32>
    %300 = arith.addf %297, %299 : vector<8x128xf32>
    %301 = vector.broadcast %111 : vector<8x1xf32> to vector<8x128xf32>
    %302 = arith.mulf %301, %187 : vector<8x128xf32>
    %303 = arith.addf %300, %302 : vector<8x128xf32>
    %304 = vector.broadcast %119 : vector<8x1xf32> to vector<8x128xf32>
    %305 = arith.mulf %304, %180 : vector<8x128xf32>
    %306 = vector.broadcast %121 : vector<8x1xf32> to vector<8x128xf32>
    %307 = arith.mulf %306, %181 : vector<8x128xf32>
    %308 = arith.addf %305, %307 : vector<8x128xf32>
    %309 = vector.broadcast %123 : vector<8x1xf32> to vector<8x128xf32>
    %310 = arith.mulf %309, %182 : vector<8x128xf32>
    %311 = arith.addf %308, %310 : vector<8x128xf32>
    %312 = vector.broadcast %125 : vector<8x1xf32> to vector<8x128xf32>
    %313 = arith.mulf %312, %183 : vector<8x128xf32>
    %314 = arith.addf %311, %313 : vector<8x128xf32>
    %315 = vector.broadcast %127 : vector<8x1xf32> to vector<8x128xf32>
    %316 = arith.mulf %315, %184 : vector<8x128xf32>
    %317 = arith.addf %314, %316 : vector<8x128xf32>
    %318 = vector.broadcast %129 : vector<8x1xf32> to vector<8x128xf32>
    %319 = arith.mulf %318, %185 : vector<8x128xf32>
    %320 = arith.addf %317, %319 : vector<8x128xf32>
    %321 = vector.broadcast %131 : vector<8x1xf32> to vector<8x128xf32>
    %322 = arith.mulf %321, %186 : vector<8x128xf32>
    %323 = arith.addf %320, %322 : vector<8x128xf32>
    %324 = vector.broadcast %133 : vector<8x1xf32> to vector<8x128xf32>
    %325 = arith.mulf %324, %187 : vector<8x128xf32>
    %326 = arith.addf %323, %325 : vector<8x128xf32>
    %327 = vector.broadcast %141 : vector<8x1xf32> to vector<8x128xf32>
    %328 = arith.mulf %327, %180 : vector<8x128xf32>
    %329 = vector.broadcast %143 : vector<8x1xf32> to vector<8x128xf32>
    %330 = arith.mulf %329, %181 : vector<8x128xf32>
    %331 = arith.addf %328, %330 : vector<8x128xf32>
    %332 = vector.broadcast %145 : vector<8x1xf32> to vector<8x128xf32>
    %333 = arith.mulf %332, %182 : vector<8x128xf32>
    %334 = arith.addf %331, %333 : vector<8x128xf32>
    %335 = vector.broadcast %147 : vector<8x1xf32> to vector<8x128xf32>
    %336 = arith.mulf %335, %183 : vector<8x128xf32>
    %337 = arith.addf %334, %336 : vector<8x128xf32>
    %338 = vector.broadcast %149 : vector<8x1xf32> to vector<8x128xf32>
    %339 = arith.mulf %338, %184 : vector<8x128xf32>
    %340 = arith.addf %337, %339 : vector<8x128xf32>
    %341 = vector.broadcast %151 : vector<8x1xf32> to vector<8x128xf32>
    %342 = arith.mulf %341, %185 : vector<8x128xf32>
    %343 = arith.addf %340, %342 : vector<8x128xf32>
    %344 = vector.broadcast %153 : vector<8x1xf32> to vector<8x128xf32>
    %345 = arith.mulf %344, %186 : vector<8x128xf32>
    %346 = arith.addf %343, %345 : vector<8x128xf32>
    %347 = vector.broadcast %155 : vector<8x1xf32> to vector<8x128xf32>
    %348 = arith.mulf %347, %187 : vector<8x128xf32>
    %349 = arith.addf %346, %348 : vector<8x128xf32>
    %350 = vector.broadcast %163 : vector<8x1xf32> to vector<8x128xf32>
    %351 = arith.mulf %350, %180 : vector<8x128xf32>
    %352 = vector.broadcast %165 : vector<8x1xf32> to vector<8x128xf32>
    %353 = arith.mulf %352, %181 : vector<8x128xf32>
    %354 = arith.addf %351, %353 : vector<8x128xf32>
    %355 = vector.broadcast %167 : vector<8x1xf32> to vector<8x128xf32>
    %356 = arith.mulf %355, %182 : vector<8x128xf32>
    %357 = arith.addf %354, %356 : vector<8x128xf32>
    %358 = vector.broadcast %169 : vector<8x1xf32> to vector<8x128xf32>
    %359 = arith.mulf %358, %183 : vector<8x128xf32>
    %360 = arith.addf %357, %359 : vector<8x128xf32>
    %361 = vector.broadcast %171 : vector<8x1xf32> to vector<8x128xf32>
    %362 = arith.mulf %361, %184 : vector<8x128xf32>
    %363 = arith.addf %360, %362 : vector<8x128xf32>
    %364 = vector.broadcast %173 : vector<8x1xf32> to vector<8x128xf32>
    %365 = arith.mulf %364, %185 : vector<8x128xf32>
    %366 = arith.addf %363, %365 : vector<8x128xf32>
    %367 = vector.broadcast %175 : vector<8x1xf32> to vector<8x128xf32>
    %368 = arith.mulf %367, %186 : vector<8x128xf32>
    %369 = arith.addf %366, %368 : vector<8x128xf32>
    %370 = vector.broadcast %177 : vector<8x1xf32> to vector<8x128xf32>
    %371 = arith.mulf %370, %187 : vector<8x128xf32>
    %372 = arith.addf %369, %371 : vector<8x128xf32>
    %373 = vector.broadcast %188 : vector<1x128xf32> to vector<8x128xf32>
    %374 = arith.addf %211, %373 : vector<8x128xf32>
    %cst_23 = arith.constant 0.000000e+00 : f32
    %375 = vector.broadcast %cst_23 : f32 to vector<8x128xf32>
    %376 = arith.maximumf %374, %375 : vector<8x128xf32>
    %377 = vector.broadcast %188 : vector<1x128xf32> to vector<8x128xf32>
    %378 = arith.addf %234, %377 : vector<8x128xf32>
    %cst_24 = arith.constant 0.000000e+00 : f32
    %379 = vector.broadcast %cst_24 : f32 to vector<8x128xf32>
    %380 = arith.maximumf %378, %379 : vector<8x128xf32>
    %381 = vector.broadcast %188 : vector<1x128xf32> to vector<8x128xf32>
    %382 = arith.addf %257, %381 : vector<8x128xf32>
    %cst_25 = arith.constant 0.000000e+00 : f32
    %383 = vector.broadcast %cst_25 : f32 to vector<8x128xf32>
    %384 = arith.maximumf %382, %383 : vector<8x128xf32>
    %385 = vector.broadcast %188 : vector<1x128xf32> to vector<8x128xf32>
    %386 = arith.addf %280, %385 : vector<8x128xf32>
    %cst_26 = arith.constant 0.000000e+00 : f32
    %387 = vector.broadcast %cst_26 : f32 to vector<8x128xf32>
    %388 = arith.maximumf %386, %387 : vector<8x128xf32>
    %389 = vector.broadcast %188 : vector<1x128xf32> to vector<8x128xf32>
    %390 = arith.addf %303, %389 : vector<8x128xf32>
    %cst_27 = arith.constant 0.000000e+00 : f32
    %391 = vector.broadcast %cst_27 : f32 to vector<8x128xf32>
    %392 = arith.maximumf %390, %391 : vector<8x128xf32>
    %393 = vector.broadcast %188 : vector<1x128xf32> to vector<8x128xf32>
    %394 = arith.addf %326, %393 : vector<8x128xf32>
    %cst_28 = arith.constant 0.000000e+00 : f32
    %395 = vector.broadcast %cst_28 : f32 to vector<8x128xf32>
    %396 = arith.maximumf %394, %395 : vector<8x128xf32>
    %397 = vector.broadcast %188 : vector<1x128xf32> to vector<8x128xf32>
    %398 = arith.addf %349, %397 : vector<8x128xf32>
    %cst_29 = arith.constant 0.000000e+00 : f32
    %399 = vector.broadcast %cst_29 : f32 to vector<8x128xf32>
    %400 = arith.maximumf %398, %399 : vector<8x128xf32>
    %401 = vector.broadcast %188 : vector<1x128xf32> to vector<8x128xf32>
    %402 = arith.addf %372, %401 : vector<8x128xf32>
    %cst_30 = arith.constant 0.000000e+00 : f32
    %403 = vector.broadcast %cst_30 : f32 to vector<8x128xf32>
    %404 = arith.maximumf %402, %403 : vector<8x128xf32>
    %405 = tpu.concatenate %376, %380, %384, %388, %392, %396, %400, %404 in 0 : vector<8x128xf32>, vector<8x128xf32>, vector<8x128xf32>, vector<8x128xf32>, vector<8x128xf32>, vector<8x128xf32>, vector<8x128xf32>, vector<8x128xf32> -> vector<64x128xf32>
    %c0_31 = arith.constant 0 : index
    %c0_32 = arith.constant 0 : index
    %406 = vector.load %arg5[%c0_31, %c0_32] : memref<128x128xf32, #tpu.memory_space<vmem>>, vector<128x128xf32>
    %cst_33 = arith.constant dense<0.000000e+00> : vector<64x128xf32>
    %407 = tpu.matmul %405, %406, %cst_33 {dimension_numbers = #tpu.dot_dimension_numbers<[1], [0], [0], [1], [0, 0, 1, 1], [], []>} : vector<64x128xf32>, vector<128x128xf32>, vector<64x128xf32> -> vector<64x128xf32>
    %408 = vector.extract_strided_slice %407 {offsets = [0, 0], sizes = [8, 128], strides = [1, 1]} : vector<64x128xf32> to vector<8x128xf32>
    %409 = vector.extract_strided_slice %407 {offsets = [8, 0], sizes = [8, 128], strides = [1, 1]} : vector<64x128xf32> to vector<8x128xf32>
    %410 = vector.extract_strided_slice %407 {offsets = [16, 0], sizes = [8, 128], strides = [1, 1]} : vector<64x128xf32> to vector<8x128xf32>
    %411 = vector.extract_strided_slice %407 {offsets = [24, 0], sizes = [8, 128], strides = [1, 1]} : vector<64x128xf32> to vector<8x128xf32>
    %412 = vector.extract_strided_slice %407 {offsets = [32, 0], sizes = [8, 128], strides = [1, 1]} : vector<64x128xf32> to vector<8x128xf32>
    %413 = vector.extract_strided_slice %407 {offsets = [40, 0], sizes = [8, 128], strides = [1, 1]} : vector<64x128xf32> to vector<8x128xf32>
    %414 = vector.extract_strided_slice %407 {offsets = [48, 0], sizes = [8, 128], strides = [1, 1]} : vector<64x128xf32> to vector<8x128xf32>
    %415 = vector.extract_strided_slice %407 {offsets = [56, 0], sizes = [8, 128], strides = [1, 1]} : vector<64x128xf32> to vector<8x128xf32>
    %c0_34 = arith.constant 0 : index
    %c0_35 = arith.constant 0 : index
    %416 = vector.load %arg6[%c0_34, %c0_35] : memref<1x128xf32, #tpu.memory_space<vmem>>, vector<1x128xf32>
    %417 = vector.broadcast %9 : vector<8x1xf32> to vector<8x128xf32>
    %418 = arith.mulf %417, %408 : vector<8x128xf32>
    %419 = vector.broadcast %11 : vector<8x1xf32> to vector<8x128xf32>
    %420 = arith.mulf %419, %409 : vector<8x128xf32>
    %421 = arith.addf %418, %420 : vector<8x128xf32>
    %422 = vector.broadcast %13 : vector<8x1xf32> to vector<8x128xf32>
    %423 = arith.mulf %422, %410 : vector<8x128xf32>
    %424 = arith.addf %421, %423 : vector<8x128xf32>
    %425 = vector.broadcast %15 : vector<8x1xf32> to vector<8x128xf32>
    %426 = arith.mulf %425, %411 : vector<8x128xf32>
    %427 = arith.addf %424, %426 : vector<8x128xf32>
    %428 = vector.broadcast %17 : vector<8x1xf32> to vector<8x128xf32>
    %429 = arith.mulf %428, %412 : vector<8x128xf32>
    %430 = arith.addf %427, %429 : vector<8x128xf32>
    %431 = vector.broadcast %19 : vector<8x1xf32> to vector<8x128xf32>
    %432 = arith.mulf %431, %413 : vector<8x128xf32>
    %433 = arith.addf %430, %432 : vector<8x128xf32>
    %434 = vector.broadcast %21 : vector<8x1xf32> to vector<8x128xf32>
    %435 = arith.mulf %434, %414 : vector<8x128xf32>
    %436 = arith.addf %433, %435 : vector<8x128xf32>
    %437 = vector.broadcast %23 : vector<8x1xf32> to vector<8x128xf32>
    %438 = arith.mulf %437, %415 : vector<8x128xf32>
    %439 = arith.addf %436, %438 : vector<8x128xf32>
    %440 = vector.broadcast %31 : vector<8x1xf32> to vector<8x128xf32>
    %441 = arith.mulf %440, %408 : vector<8x128xf32>
    %442 = vector.broadcast %33 : vector<8x1xf32> to vector<8x128xf32>
    %443 = arith.mulf %442, %409 : vector<8x128xf32>
    %444 = arith.addf %441, %443 : vector<8x128xf32>
    %445 = vector.broadcast %35 : vector<8x1xf32> to vector<8x128xf32>
    %446 = arith.mulf %445, %410 : vector<8x128xf32>
    %447 = arith.addf %444, %446 : vector<8x128xf32>
    %448 = vector.broadcast %37 : vector<8x1xf32> to vector<8x128xf32>
    %449 = arith.mulf %448, %411 : vector<8x128xf32>
    %450 = arith.addf %447, %449 : vector<8x128xf32>
    %451 = vector.broadcast %39 : vector<8x1xf32> to vector<8x128xf32>
    %452 = arith.mulf %451, %412 : vector<8x128xf32>
    %453 = arith.addf %450, %452 : vector<8x128xf32>
    %454 = vector.broadcast %41 : vector<8x1xf32> to vector<8x128xf32>
    %455 = arith.mulf %454, %413 : vector<8x128xf32>
    %456 = arith.addf %453, %455 : vector<8x128xf32>
    %457 = vector.broadcast %43 : vector<8x1xf32> to vector<8x128xf32>
    %458 = arith.mulf %457, %414 : vector<8x128xf32>
    %459 = arith.addf %456, %458 : vector<8x128xf32>
    %460 = vector.broadcast %45 : vector<8x1xf32> to vector<8x128xf32>
    %461 = arith.mulf %460, %415 : vector<8x128xf32>
    %462 = arith.addf %459, %461 : vector<8x128xf32>
    %463 = vector.broadcast %53 : vector<8x1xf32> to vector<8x128xf32>
    %464 = arith.mulf %463, %408 : vector<8x128xf32>
    %465 = vector.broadcast %55 : vector<8x1xf32> to vector<8x128xf32>
    %466 = arith.mulf %465, %409 : vector<8x128xf32>
    %467 = arith.addf %464, %466 : vector<8x128xf32>
    %468 = vector.broadcast %57 : vector<8x1xf32> to vector<8x128xf32>
    %469 = arith.mulf %468, %410 : vector<8x128xf32>
    %470 = arith.addf %467, %469 : vector<8x128xf32>
    %471 = vector.broadcast %59 : vector<8x1xf32> to vector<8x128xf32>
    %472 = arith.mulf %471, %411 : vector<8x128xf32>
    %473 = arith.addf %470, %472 : vector<8x128xf32>
    %474 = vector.broadcast %61 : vector<8x1xf32> to vector<8x128xf32>
    %475 = arith.mulf %474, %412 : vector<8x128xf32>
    %476 = arith.addf %473, %475 : vector<8x128xf32>
    %477 = vector.broadcast %63 : vector<8x1xf32> to vector<8x128xf32>
    %478 = arith.mulf %477, %413 : vector<8x128xf32>
    %479 = arith.addf %476, %478 : vector<8x128xf32>
    %480 = vector.broadcast %65 : vector<8x1xf32> to vector<8x128xf32>
    %481 = arith.mulf %480, %414 : vector<8x128xf32>
    %482 = arith.addf %479, %481 : vector<8x128xf32>
    %483 = vector.broadcast %67 : vector<8x1xf32> to vector<8x128xf32>
    %484 = arith.mulf %483, %415 : vector<8x128xf32>
    %485 = arith.addf %482, %484 : vector<8x128xf32>
    %486 = vector.broadcast %75 : vector<8x1xf32> to vector<8x128xf32>
    %487 = arith.mulf %486, %408 : vector<8x128xf32>
    %488 = vector.broadcast %77 : vector<8x1xf32> to vector<8x128xf32>
    %489 = arith.mulf %488, %409 : vector<8x128xf32>
    %490 = arith.addf %487, %489 : vector<8x128xf32>
    %491 = vector.broadcast %79 : vector<8x1xf32> to vector<8x128xf32>
    %492 = arith.mulf %491, %410 : vector<8x128xf32>
    %493 = arith.addf %490, %492 : vector<8x128xf32>
    %494 = vector.broadcast %81 : vector<8x1xf32> to vector<8x128xf32>
    %495 = arith.mulf %494, %411 : vector<8x128xf32>
    %496 = arith.addf %493, %495 : vector<8x128xf32>
    %497 = vector.broadcast %83 : vector<8x1xf32> to vector<8x128xf32>
    %498 = arith.mulf %497, %412 : vector<8x128xf32>
    %499 = arith.addf %496, %498 : vector<8x128xf32>
    %500 = vector.broadcast %85 : vector<8x1xf32> to vector<8x128xf32>
    %501 = arith.mulf %500, %413 : vector<8x128xf32>
    %502 = arith.addf %499, %501 : vector<8x128xf32>
    %503 = vector.broadcast %87 : vector<8x1xf32> to vector<8x128xf32>
    %504 = arith.mulf %503, %414 : vector<8x128xf32>
    %505 = arith.addf %502, %504 : vector<8x128xf32>
    %506 = vector.broadcast %89 : vector<8x1xf32> to vector<8x128xf32>
    %507 = arith.mulf %506, %415 : vector<8x128xf32>
    %508 = arith.addf %505, %507 : vector<8x128xf32>
    %509 = vector.broadcast %97 : vector<8x1xf32> to vector<8x128xf32>
    %510 = arith.mulf %509, %408 : vector<8x128xf32>
    %511 = vector.broadcast %99 : vector<8x1xf32> to vector<8x128xf32>
    %512 = arith.mulf %511, %409 : vector<8x128xf32>
    %513 = arith.addf %510, %512 : vector<8x128xf32>
    %514 = vector.broadcast %101 : vector<8x1xf32> to vector<8x128xf32>
    %515 = arith.mulf %514, %410 : vector<8x128xf32>
    %516 = arith.addf %513, %515 : vector<8x128xf32>
    %517 = vector.broadcast %103 : vector<8x1xf32> to vector<8x128xf32>
    %518 = arith.mulf %517, %411 : vector<8x128xf32>
    %519 = arith.addf %516, %518 : vector<8x128xf32>
    %520 = vector.broadcast %105 : vector<8x1xf32> to vector<8x128xf32>
    %521 = arith.mulf %520, %412 : vector<8x128xf32>
    %522 = arith.addf %519, %521 : vector<8x128xf32>
    %523 = vector.broadcast %107 : vector<8x1xf32> to vector<8x128xf32>
    %524 = arith.mulf %523, %413 : vector<8x128xf32>
    %525 = arith.addf %522, %524 : vector<8x128xf32>
    %526 = vector.broadcast %109 : vector<8x1xf32> to vector<8x128xf32>
    %527 = arith.mulf %526, %414 : vector<8x128xf32>
    %528 = arith.addf %525, %527 : vector<8x128xf32>
    %529 = vector.broadcast %111 : vector<8x1xf32> to vector<8x128xf32>
    %530 = arith.mulf %529, %415 : vector<8x128xf32>
    %531 = arith.addf %528, %530 : vector<8x128xf32>
    %532 = vector.broadcast %119 : vector<8x1xf32> to vector<8x128xf32>
    %533 = arith.mulf %532, %408 : vector<8x128xf32>
    %534 = vector.broadcast %121 : vector<8x1xf32> to vector<8x128xf32>
    %535 = arith.mulf %534, %409 : vector<8x128xf32>
    %536 = arith.addf %533, %535 : vector<8x128xf32>
    %537 = vector.broadcast %123 : vector<8x1xf32> to vector<8x128xf32>
    %538 = arith.mulf %537, %410 : vector<8x128xf32>
    %539 = arith.addf %536, %538 : vector<8x128xf32>
    %540 = vector.broadcast %125 : vector<8x1xf32> to vector<8x128xf32>
    %541 = arith.mulf %540, %411 : vector<8x128xf32>
    %542 = arith.addf %539, %541 : vector<8x128xf32>
    %543 = vector.broadcast %127 : vector<8x1xf32> to vector<8x128xf32>
    %544 = arith.mulf %543, %412 : vector<8x128xf32>
    %545 = arith.addf %542, %544 : vector<8x128xf32>
    %546 = vector.broadcast %129 : vector<8x1xf32> to vector<8x128xf32>
    %547 = arith.mulf %546, %413 : vector<8x128xf32>
    %548 = arith.addf %545, %547 : vector<8x128xf32>
    %549 = vector.broadcast %131 : vector<8x1xf32> to vector<8x128xf32>
    %550 = arith.mulf %549, %414 : vector<8x128xf32>
    %551 = arith.addf %548, %550 : vector<8x128xf32>
    %552 = vector.broadcast %133 : vector<8x1xf32> to vector<8x128xf32>
    %553 = arith.mulf %552, %415 : vector<8x128xf32>
    %554 = arith.addf %551, %553 : vector<8x128xf32>
    %555 = vector.broadcast %141 : vector<8x1xf32> to vector<8x128xf32>
    %556 = arith.mulf %555, %408 : vector<8x128xf32>
    %557 = vector.broadcast %143 : vector<8x1xf32> to vector<8x128xf32>
    %558 = arith.mulf %557, %409 : vector<8x128xf32>
    %559 = arith.addf %556, %558 : vector<8x128xf32>
    %560 = vector.broadcast %145 : vector<8x1xf32> to vector<8x128xf32>
    %561 = arith.mulf %560, %410 : vector<8x128xf32>
    %562 = arith.addf %559, %561 : vector<8x128xf32>
    %563 = vector.broadcast %147 : vector<8x1xf32> to vector<8x128xf32>
    %564 = arith.mulf %563, %411 : vector<8x128xf32>
    %565 = arith.addf %562, %564 : vector<8x128xf32>
    %566 = vector.broadcast %149 : vector<8x1xf32> to vector<8x128xf32>
    %567 = arith.mulf %566, %412 : vector<8x128xf32>
    %568 = arith.addf %565, %567 : vector<8x128xf32>
    %569 = vector.broadcast %151 : vector<8x1xf32> to vector<8x128xf32>
    %570 = arith.mulf %569, %413 : vector<8x128xf32>
    %571 = arith.addf %568, %570 : vector<8x128xf32>
    %572 = vector.broadcast %153 : vector<8x1xf32> to vector<8x128xf32>
    %573 = arith.mulf %572, %414 : vector<8x128xf32>
    %574 = arith.addf %571, %573 : vector<8x128xf32>
    %575 = vector.broadcast %155 : vector<8x1xf32> to vector<8x128xf32>
    %576 = arith.mulf %575, %415 : vector<8x128xf32>
    %577 = arith.addf %574, %576 : vector<8x128xf32>
    %578 = vector.broadcast %163 : vector<8x1xf32> to vector<8x128xf32>
    %579 = arith.mulf %578, %408 : vector<8x128xf32>
    %580 = vector.broadcast %165 : vector<8x1xf32> to vector<8x128xf32>
    %581 = arith.mulf %580, %409 : vector<8x128xf32>
    %582 = arith.addf %579, %581 : vector<8x128xf32>
    %583 = vector.broadcast %167 : vector<8x1xf32> to vector<8x128xf32>
    %584 = arith.mulf %583, %410 : vector<8x128xf32>
    %585 = arith.addf %582, %584 : vector<8x128xf32>
    %586 = vector.broadcast %169 : vector<8x1xf32> to vector<8x128xf32>
    %587 = arith.mulf %586, %411 : vector<8x128xf32>
    %588 = arith.addf %585, %587 : vector<8x128xf32>
    %589 = vector.broadcast %171 : vector<8x1xf32> to vector<8x128xf32>
    %590 = arith.mulf %589, %412 : vector<8x128xf32>
    %591 = arith.addf %588, %590 : vector<8x128xf32>
    %592 = vector.broadcast %173 : vector<8x1xf32> to vector<8x128xf32>
    %593 = arith.mulf %592, %413 : vector<8x128xf32>
    %594 = arith.addf %591, %593 : vector<8x128xf32>
    %595 = vector.broadcast %175 : vector<8x1xf32> to vector<8x128xf32>
    %596 = arith.mulf %595, %414 : vector<8x128xf32>
    %597 = arith.addf %594, %596 : vector<8x128xf32>
    %598 = vector.broadcast %177 : vector<8x1xf32> to vector<8x128xf32>
    %599 = arith.mulf %598, %415 : vector<8x128xf32>
    %600 = arith.addf %597, %599 : vector<8x128xf32>
    %601 = vector.broadcast %416 : vector<1x128xf32> to vector<8x128xf32>
    %602 = arith.addf %439, %601 : vector<8x128xf32>
    %cst_36 = arith.constant 0.000000e+00 : f32
    %603 = vector.broadcast %cst_36 : f32 to vector<8x128xf32>
    %604 = arith.maximumf %602, %603 : vector<8x128xf32>
    %605 = vector.broadcast %416 : vector<1x128xf32> to vector<8x128xf32>
    %606 = arith.addf %462, %605 : vector<8x128xf32>
    %cst_37 = arith.constant 0.000000e+00 : f32
    %607 = vector.broadcast %cst_37 : f32 to vector<8x128xf32>
    %608 = arith.maximumf %606, %607 : vector<8x128xf32>
    %609 = vector.broadcast %416 : vector<1x128xf32> to vector<8x128xf32>
    %610 = arith.addf %485, %609 : vector<8x128xf32>
    %cst_38 = arith.constant 0.000000e+00 : f32
    %611 = vector.broadcast %cst_38 : f32 to vector<8x128xf32>
    %612 = arith.maximumf %610, %611 : vector<8x128xf32>
    %613 = vector.broadcast %416 : vector<1x128xf32> to vector<8x128xf32>
    %614 = arith.addf %508, %613 : vector<8x128xf32>
    %cst_39 = arith.constant 0.000000e+00 : f32
    %615 = vector.broadcast %cst_39 : f32 to vector<8x128xf32>
    %616 = arith.maximumf %614, %615 : vector<8x128xf32>
    %617 = vector.broadcast %416 : vector<1x128xf32> to vector<8x128xf32>
    %618 = arith.addf %531, %617 : vector<8x128xf32>
    %cst_40 = arith.constant 0.000000e+00 : f32
    %619 = vector.broadcast %cst_40 : f32 to vector<8x128xf32>
    %620 = arith.maximumf %618, %619 : vector<8x128xf32>
    %621 = vector.broadcast %416 : vector<1x128xf32> to vector<8x128xf32>
    %622 = arith.addf %554, %621 : vector<8x128xf32>
    %cst_41 = arith.constant 0.000000e+00 : f32
    %623 = vector.broadcast %cst_41 : f32 to vector<8x128xf32>
    %624 = arith.maximumf %622, %623 : vector<8x128xf32>
    %625 = vector.broadcast %416 : vector<1x128xf32> to vector<8x128xf32>
    %626 = arith.addf %577, %625 : vector<8x128xf32>
    %cst_42 = arith.constant 0.000000e+00 : f32
    %627 = vector.broadcast %cst_42 : f32 to vector<8x128xf32>
    %628 = arith.maximumf %626, %627 : vector<8x128xf32>
    %629 = vector.broadcast %416 : vector<1x128xf32> to vector<8x128xf32>
    %630 = arith.addf %600, %629 : vector<8x128xf32>
    %cst_43 = arith.constant 0.000000e+00 : f32
    %631 = vector.broadcast %cst_43 : f32 to vector<8x128xf32>
    %632 = arith.maximumf %630, %631 : vector<8x128xf32>
    %633 = arith.addf %604, %608 : vector<8x128xf32>
    %634 = arith.addf %633, %612 : vector<8x128xf32>
    %635 = arith.addf %634, %616 : vector<8x128xf32>
    %636 = arith.addf %635, %620 : vector<8x128xf32>
    %637 = arith.addf %636, %624 : vector<8x128xf32>
    %638 = arith.addf %637, %628 : vector<8x128xf32>
    %639 = arith.addf %638, %632 : vector<8x128xf32>
    %cst_44 = arith.constant 1.250000e-01 : f32
    %640 = vector.broadcast %cst_44 : f32 to vector<8x128xf32>
    %641 = arith.mulf %639, %640 : vector<8x128xf32>
    %c0_45 = arith.constant 0 : index
    %c0_46 = arith.constant 0 : index
    %642 = vector.load %arg7[%c0_45, %c0_46] : memref<128x256xf32, #tpu.memory_space<vmem>>, vector<128x256xf32>
    %cst_47 = arith.constant dense<0.000000e+00> : vector<8x256xf32>
    %643 = tpu.matmul %641, %642, %cst_47 {dimension_numbers = #tpu.dot_dimension_numbers<[1], [0], [0], [1], [0, 0, 1, 1], [], []>} : vector<8x128xf32>, vector<128x256xf32>, vector<8x256xf32> -> vector<8x256xf32>
    %c0_48 = arith.constant 0 : index
    %c0_49 = arith.constant 0 : index
    %644 = vector.load %arg8[%c0_48, %c0_49] : memref<1x256xf32, #tpu.memory_space<vmem>>, vector<1x256xf32>
    %645 = vector.broadcast %644 : vector<1x256xf32> to vector<8x256xf32>
    %646 = arith.addf %643, %645 : vector<8x256xf32>
    %cst_50 = arith.constant 0.000000e+00 : f32
    %647 = vector.broadcast %cst_50 : f32 to vector<8x256xf32>
    %648 = arith.maximumf %646, %647 : vector<8x256xf32>
    %c0_51 = arith.constant 0 : index
    %c0_52 = arith.constant 0 : index
    %649 = vector.load %arg9[%c0_51, %c0_52] : memref<256x128xf32, #tpu.memory_space<vmem>>, vector<256x128xf32>
    %cst_53 = arith.constant dense<0.000000e+00> : vector<8x128xf32>
    %650 = tpu.matmul %648, %649, %cst_53 {dimension_numbers = #tpu.dot_dimension_numbers<[1], [0], [0], [1], [0, 0, 1, 1], [], []>} : vector<8x256xf32>, vector<256x128xf32>, vector<8x128xf32> -> vector<8x128xf32>
    %c0_54 = arith.constant 0 : index
    %c0_55 = arith.constant 0 : index
    %651 = vector.load %arg10[%c0_54, %c0_55] : memref<1x128xf32, #tpu.memory_space<vmem>>, vector<1x128xf32>
    %652 = vector.broadcast %651 : vector<1x128xf32> to vector<8x128xf32>
    %653 = arith.addf %650, %652 : vector<8x128xf32>
    %cst_56 = arith.constant 0.000000e+00 : f32
    %654 = vector.broadcast %cst_56 : f32 to vector<8x128xf32>
    %655 = arith.maximumf %653, %654 : vector<8x128xf32>
    %c0_57 = arith.constant 0 : index
    %c0_58 = arith.constant 0 : index
    %656 = vector.load %arg11[%c0_57, %c0_58] : memref<128x128xf32, #tpu.memory_space<vmem>>, vector<128x128xf32>
    %cst_59 = arith.constant dense<0.000000e+00> : vector<8x128xf32>
    %657 = tpu.matmul %655, %656, %cst_59 {dimension_numbers = #tpu.dot_dimension_numbers<[1], [0], [0], [1], [0, 0, 1, 1], [], []>} : vector<8x128xf32>, vector<128x128xf32>, vector<8x128xf32> -> vector<8x128xf32>
    %c0_60 = arith.constant 0 : index
    %c0_61 = arith.constant 0 : index
    %658 = vector.load %arg12[%c0_60, %c0_61] : memref<1x128xf32, #tpu.memory_space<vmem>>, vector<1x128xf32>
    %659 = vector.broadcast %658 : vector<1x128xf32> to vector<8x128xf32>
    %660 = arith.addf %657, %659 : vector<8x128xf32>
    %661 = tpu.iota {dimensions = array<i32: 1>} : vector<8x128xi32>
    %c8_i32 = arith.constant 8 : i32
    %662 = vector.broadcast %c8_i32 : i32 to vector<8x128xi32>
    %663 = arith.cmpi slt, %661, %662 : vector<8x128xi32>
    %cst_62 = arith.constant 0xFF800000 : f32
    %664 = vector.broadcast %cst_62 : f32 to vector<8x128xf32>
    %665 = arith.select %663, %660, %664 : vector<8x128xi1>, vector<8x128xf32>
    %cst_63 = arith.constant dense<0xFF800000> : vector<8xf32>
    %666 = vector.multi_reduction <maximumf>, %665, %cst_63 [1] : vector<8x128xf32> to vector<8xf32>
    %667 = vector.shape_cast %666 : vector<8xf32> to vector<8x1xf32>
    %668 = vector.broadcast %667 : vector<8x1xf32> to vector<8x128xf32>
    %669 = arith.subf %660, %668 : vector<8x128xf32>
    %cst_64 = arith.constant 0xFF800000 : f32
    %670 = vector.broadcast %cst_64 : f32 to vector<8x128xf32>
    %671 = arith.select %663, %669, %670 : vector<8x128xi1>, vector<8x128xf32>
    %672 = math.exp %671 : vector<8x128xf32>
    %cst_65 = arith.constant dense<0.000000e+00> : vector<8xf32>
    %673 = vector.multi_reduction <add>, %672, %cst_65 [1] : vector<8x128xf32> to vector<8xf32>
    %674 = vector.shape_cast %673 : vector<8xf32> to vector<8x1xf32>
    %675 = tpu.reciprocal %674 : vector<8x1xf32> -> vector<8x1xf32>
    %676 = vector.broadcast %675 : vector<8x1xf32> to vector<8x128xf32>
    %677 = arith.mulf %672, %676 : vector<8x128xf32>
    %c8_i32_66 = arith.constant 8 : i32
    %678 = vector.broadcast %c8_i32_66 : i32 to vector<8x128xi32>
    %679 = arith.cmpi eq, %661, %678 : vector<8x128xi32>
    %cst_67 = arith.constant 0.000000e+00 : f32
    %680 = vector.broadcast %cst_67 : f32 to vector<8x128xf32>
    %681 = arith.select %679, %660, %680 : vector<8x128xi1>, vector<8x128xf32>
    %682 = arith.select %663, %677, %681 : vector<8x128xi1>, vector<8x128xf32>
    %c0_68 = arith.constant 0 : index
    %c0_69 = arith.constant 0 : index
    %683 = vector.load %arg13[%c0_68, %c0_69] : memref<8x128xf32, #tpu.memory_space<vmem>>, vector<8x128xf32>
    tpu.vector_store %arg13[%c0_68, %c0_69], %682 {strides = array<i32>} : memref<8x128xf32, #tpu.memory_space<vmem>>, vector<8x128xf32>,
    return
  }
  func.func @transform_0(%arg0: i32) -> (i32, i32) {
    %c0_i32 = arith.constant 0 : i32
    %c0_i32_0 = arith.constant 0 : i32
    return %arg0, %c0_i32 : i32, i32
  }
  func.func @transform_1(%arg0: i32) -> (i32, i32) {
    %c0_i32 = arith.constant 0 : i32
    %c0_i32_0 = arith.constant 0 : i32
    return %arg0, %c0_i32 : i32, i32
  }
  func.func @transform_2(%arg0: i32) -> (i32, i32) {
    %c0_i32 = arith.constant 0 : i32
    %c0_i32_0 = arith.constant 0 : i32
    %c0_i32_1 = arith.constant 0 : i32
    return %c0_i32, %c0_i32_0 : i32, i32
  }
  func.func @transform_3(%arg0: i32) -> (i32, i32) {
    %c0_i32 = arith.constant 0 : i32
    %c0_i32_0 = arith.constant 0 : i32
    %c0_i32_1 = arith.constant 0 : i32
    return %c0_i32, %c0_i32_0 : i32, i32
  }
  func.func @transform_4(%arg0: i32) -> (i32, i32) {
    %c0_i32 = arith.constant 0 : i32
    %c0_i32_0 = arith.constant 0 : i32
    %c0_i32_1 = arith.constant 0 : i32
    return %c0_i32, %c0_i32_0 : i32, i32
  }
  func.func @transform_5(%arg0: i32) -> (i32, i32) {
    %c0_i32 = arith.constant 0 : i32
    %c0_i32_0 = arith.constant 0 : i32
    %c0_i32_1 = arith.constant 0 : i32
    return %c0_i32, %c0_i32_0 : i32, i32
  }
  func.func @transform_6(%arg0: i32) -> (i32, i32) {
    %c0_i32 = arith.constant 0 : i32
    %c0_i32_0 = arith.constant 0 : i32
    %c0_i32_1 = arith.constant 0 : i32
    return %c0_i32, %c0_i32_0 : i32, i32
  }
  func.func @transform_7(%arg0: i32) -> (i32, i32) {
    %c0_i32 = arith.constant 0 : i32
    %c0_i32_0 = arith.constant 0 : i32
    %c0_i32_1 = arith.constant 0 : i32
    return %c0_i32, %c0_i32_0 : i32, i32
  }
  func.func @transform_8(%arg0: i32) -> (i32, i32) {
    %c0_i32 = arith.constant 0 : i32
    %c0_i32_0 = arith.constant 0 : i32
    %c0_i32_1 = arith.constant 0 : i32
    return %c0_i32, %c0_i32_0 : i32, i32
  }
  func.func @transform_9(%arg0: i32) -> (i32, i32) {
    %c0_i32 = arith.constant 0 : i32
    %c0_i32_0 = arith.constant 0 : i32
    %c0_i32_1 = arith.constant 0 : i32
    return %c0_i32, %c0_i32_0 : i32, i32
  }
  func.func @transform_10(%arg0: i32) -> (i32, i32) {
    %c0_i32 = arith.constant 0 : i32
    %c0_i32_0 = arith.constant 0 : i32
    %c0_i32_1 = arith.constant 0 : i32
    return %c0_i32, %c0_i32_0 : i32, i32
  }
  func.func @transform_11(%arg0: i32) -> (i32, i32) {
    %c0_i32 = arith.constant 0 : i32
    %c0_i32_0 = arith.constant 0 : i32
    %c0_i32_1 = arith.constant 0 : i32
    return %c0_i32, %c0_i32_0 : i32, i32
  }
  func.func @transform_12(%arg0: i32) -> (i32, i32) {
    %c0_i32 = arith.constant 0 : i32
    %c0_i32_0 = arith.constant 0 : i32
    return %arg0, %c0_i32 : i32, i32
  }
}

</mosaic_0001>

<bundles_post_ra>
// kernel: tpu_custom_call.1
= control target key start
LH: loop header
LB: loop body
LE: loop exit
PB: predicated region body
PF: predicated region fallthrough
CT: control target
= control target key end

     0   :  { %17 = vsyncpa [#allocation3], 0  ;;  %s2969_s0 = inlined_call_operand.hbm [shape: f32[8,32], index: 0, kind: input, shape index: {}]   ;;  %s2970_s1 = inlined_call_operand.hbm [shape: f32[8,64], index: 1, kind: input, shape index: {}]   ;;  %s2971_s2 = inlined_call_operand.hbm [shape: f32[32,1024], index: 2, kind: input, shape index: {}]   ;;  %s2972_s3 = inlined_call_operand.vmem [shape: f32[1,128], index: 3, kind: input, shape index: {}]   ;;  %s2973_s4 = inlined_call_operand.hbm [shape: f32[128,128], index: 4, kind: input, shape index: {}]   ;;  %s2974_s5 = inlined_call_operand.vmem [shape: f32[1,128], index: 5, kind: input, shape index: {}]   ;;  %s2975_s6 = inlined_call_operand.hbm [shape: f32[128,256], index: 6, kind: input, shape index: {}]   ;;  %s2976_s7 = inlined_call_operand.vmem [shape: f32[1,256], index: 7, kind: input, shape index: {}]   ;;  %s2977_s8 = inlined_call_operand.hbm [shape: f32[256,128], index: 8, kind: input, shape index: {}]   ;;  %s2978_s9 = inlined_call_operand.vmem [shape: f32[1,128], index: 9, kind: input, shape index: {}]   ;;  %s2979_s10 = inlined_call_operand.hbm [shape: f32[128,128], index: 10, kind: input, shape index: {}]   ;;  %s2980_s11 = inlined_call_operand.vmem [shape: f32[1,128], index: 11, kind: input, shape index: {}]   ;;  %s2981_s12 = inlined_call_operand.hbm [shape: f32[8,128], index: 12, kind: output, shape index: {}]  }
   0x1   :  { %18 = vsyncpa [#allocation6], 0 }
   0x2   :  { %19 = vsyncpa [#allocation9], 0 }
   0x3   :  { %20 = vsyncpa [#allocation12], 0 }
   0x4   :  { %21 = vsyncpa [#allocation4], 0  ;;  %s2234_s21 = smov [#allocation5]   ;;  %s2235_s23 = smov [#allocation8]  }
   0x5   :  { %s38_s22 = sshll.u32 %s2234_s21, 4  ;;  %s61_s24 = sshll.u32 %s2235_s23, 4  ;;  %s39_s22 = int_to_ptr.vmem [resolvable:$true] %s38_s22  ;;  %s2387_s24 = int_to_ptr.vmem [resolvable:$true] %s61_s24 }
   0x6   :  { %s2048_s27 = scalar_lea.hbm %s2970_s1, 128 }
   0x7   :  { %p2049_p0 = scmp.ne.s32.totalorder %s2970_s1, %s2048_s27  ;;  %p2052_p1 = scmp.lt.u32.totalorder %s2048_s27, %s2970_s1 }
   0x9   :  { %p2054_p2 = pnand %p2052_p1, %p2049_p0 }
   0xb   :  { %2057 = shalt.err (!%p2054_p2)
}
   0xc   :  { %s2058_s14 = scalar_lea.vmem %s39_s22, 128  ;;  %p2063_p4 = scmp.lt.s32.totalorder %s39_s22, %s39_s22 }
   0xd   :  { %p2059_p3 = scmp.ne.s32.totalorder %s39_s22, %s2058_s14  ;;  %p2064_p5 = scmp.lt.s32.totalorder %s2058_s14, %s2058_s14 }
   0xf   :  { %p2065_p6 = por %p2064_p5, %p2063_p4 }
  0x11   :  { %p2066_p7 = pnand %p2065_p6, %p2059_p3 }
  0x13   :  { %2069 = shalt.err (!%p2066_p7)
}
  0x14   :  { %41 = dma.hbm_to_vmem [thread:$0]  %s2970_s1, 128, %s39_s22, [#allocation6]  }
  0x15   :  { %s2070_s19 = scalar_lea.hbm %s2973_s4, 2048 }
  0x16   :  { %p2071_p8 = scmp.ne.s32.totalorder %s2973_s4, %s2070_s19  ;;  %p2074_p9 = scmp.lt.u32.totalorder %s2070_s19, %s2973_s4 }
  0x18   :  { %p2076_p10 = pnand %p2074_p9, %p2071_p8 }
  0x1a   :  { %2079 = shalt.err (!%p2076_p10)
}
  0x1b   :  { %s2080_s26 = scalar_lea.vmem %s2387_s24, 2048  ;;  %p2085_p12 = scmp.lt.s32.totalorder %s2387_s24, %s2387_s24 }
  0x1c   :  { %p2081_p11 = scmp.ne.s32.totalorder %s2387_s24, %s2080_s26  ;;  %p2086_p13 = scmp.lt.s32.totalorder %s2080_s26, %s2080_s26 }
  0x1e   :  { %p2087_p0 = por %p2086_p13, %p2085_p12 }
  0x20   :  { %p2088_p1 = pnand %p2087_p0, %p2081_p11 }
  0x22   :  { %2091 = shalt.err (!%p2088_p1)
}
  0x23   :  { %s2236_s1 = smov 128   ;;  %s2237_s22 = smov 8  }
  0x24   :  { %67 = dma.hbm_to_vmem [thread:$0]  %s2973_s4, 2048, %s2387_s24, [#allocation9], %s2236_s1, %s2236_s1, %s2237_s22  }
  0x25   :  { %s2238_s29 = smov [#allocation11]   ;;  %s2239_s13 = smov [#allocation2]  }
  0x26   :  { %s89_s30 = sshll.u32 %s2238_s29, 4  ;;  %s28_s14 = sshll.u32 %s2239_s13, 4  ;;  %s90_s30 = int_to_ptr.vmem [resolvable:$true] %s89_s30  ;;  %s29_s14 = int_to_ptr.vmem [resolvable:$true] %s28_s14 }
  0x27   :  { %s2092_s17 = scalar_lea.hbm %s2977_s8, 4096 }
  0x28   :  { %p2093_p2 = scmp.ne.s32.totalorder %s2977_s8, %s2092_s17  ;;  %p2096_p3 = scmp.lt.u32.totalorder %s2092_s17, %s2977_s8 }
  0x2a   :  { %p2098_p4 = pnand %p2096_p3, %p2093_p2 }
  0x2c   :  { %2101 = shalt.err (!%p2098_p4)
}
  0x2d   :  { %s2102_s4 = scalar_lea.vmem %s90_s30, 4096  ;;  %p2107_p6 = scmp.lt.s32.totalorder %s90_s30, %s90_s30 }
  0x2e   :  { %p2103_p5 = scmp.ne.s32.totalorder %s90_s30, %s2102_s4  ;;  %p2108_p7 = scmp.lt.s32.totalorder %s2102_s4, %s2102_s4 }
  0x30   :  { %p2109_p8 = por %p2108_p7, %p2107_p6 }
  0x32   :  { %p2110_p9 = pnand %p2109_p8, %p2103_p5 }
  0x34   :  { %2113 = shalt.err (!%p2110_p9)
}
  0x35   :  { %95 = dma.hbm_to_vmem [thread:$0]  %s2977_s8, 4096, %s90_s30, [#allocation12], %s2236_s1, %s2236_s1, %s2237_s22  }
  0x36   :  { %s2114_s27 = scalar_lea.hbm %s2969_s0, 128 }
  0x37   :  { %p2115_p10 = scmp.ne.s32.totalorder %s2969_s0, %s2114_s27  ;;  %p2118_p11 = scmp.lt.u32.totalorder %s2114_s27, %s2969_s0 }
  0x39   :  { %p2120_p12 = pnand %p2118_p11, %p2115_p10 }
  0x3b   :  { %2123 = shalt.err (!%p2120_p12)
}
  0x3c   :  { %s2124_s16 = scalar_lea.vmem %s29_s14, 128  ;;  %p2129_p0 = scmp.lt.s32.totalorder %s29_s14, %s29_s14 }
  0x3d   :  { %p2125_p13 = scmp.ne.s32.totalorder %s29_s14, %s2124_s16  ;;  %p2130_p1 = scmp.lt.s32.totalorder %s2124_s16, %s2124_s16 }
  0x3f   :  { %p2131_p2 = por %p2130_p1, %p2129_p0 }
  0x41   :  { %p2132_p3 = pnand %p2131_p2, %p2125_p13 }
  0x43   :  { %2135 = shalt.err (!%p2132_p3)
}
  0x44   :  { %31 = dma.hbm_to_vmem [thread:$0]  %s2969_s0, 128, %s29_s14, [#allocation3]  }
  0x45   :  { %s2240_s17 = smov [#allocation7]   ;;  %s2136_s21 = scalar_lea.hbm %s2971_s2, 4096 }
  0x46   :  { %s47_s18 = sshll.u32 %s2240_s17, 4  ;;  %p2137_p4 = scmp.ne.s32.totalorder %s2971_s2, %s2136_s21  ;;  %s48_s18 = int_to_ptr.vmem [resolvable:$true] %s47_s18 }
  0x47   :  { %p2140_p5 = scmp.lt.u32.totalorder %s2136_s21, %s2971_s2 }
  0x49   :  { %p2142_p6 = pnand %p2140_p5, %p2137_p4 }
  0x4b   :  { %2145 = shalt.err (!%p2142_p6)
}
  0x4c   :  { %s2146_s26 = scalar_lea.vmem %s48_s18, 4096  ;;  %p2151_p8 = scmp.lt.s32.totalorder %s48_s18, %s48_s18 }
  0x4d   :  { %p2147_p7 = scmp.ne.s32.totalorder %s48_s18, %s2146_s26  ;;  %p2152_p9 = scmp.lt.s32.totalorder %s2146_s26, %s2146_s26 }
  0x4f   :  { %p2153_p10 = por %p2152_p9, %p2151_p8 }
  0x51   :  { %p2154_p11 = pnand %p2153_p10, %p2147_p7 }
  0x53   :  { %2157 = shalt.err (!%p2154_p11)
}
  0x54   :  { %s2241_s0 = smov 1024   ;;  %s2242_s14 = smov 64  }
  0x55   :  { %53 = dma.hbm_to_vmem [thread:$0]  %s2971_s2, 4096, %s48_s18, [#allocation6], %s2241_s0, %s2241_s0, %s2242_s14  }
  0x56   :  { %s2243_s29 = smov [#allocation10]   ;;  %s2158_s8 = scalar_lea.hbm %s2975_s6, 4096 }
  0x57   :  { %s75_s13 = sshll.u32 %s2243_s29, 4  ;;  %p2159_p12 = scmp.ne.s32.totalorder %s2975_s6, %s2158_s8  ;;  %s76_s13 = int_to_ptr.vmem [resolvable:$true] %s75_s13 }
  0x58   :  { %p2162_p13 = scmp.lt.u32.totalorder %s2158_s8, %s2975_s6 }
  0x5a   :  { %p2164_p0 = pnand %p2162_p13, %p2159_p12 }
  0x5c   :  { %2167 = shalt.err (!%p2164_p0)
}
  0x5d   :  { %s2168_s21 = scalar_lea.vmem %s76_s13, 4096  ;;  %p2173_p2 = scmp.lt.s32.totalorder %s76_s13, %s76_s13 }
  0x5e   :  { %p2169_p1 = scmp.ne.s32.totalorder %s76_s13, %s2168_s21  ;;  %p2174_p3 = scmp.lt.s32.totalorder %s2168_s21, %s2168_s21 }
  0x60   :  { %p2175_p4 = por %p2174_p3, %p2173_p2 }
  0x62   :  { %p2176_p5 = pnand %p2175_p4, %p2169_p1 }
  0x64   :  { %2179 = shalt.err (!%p2176_p5)
}
  0x65   :  { %s2244_s2 = smov 256   ;;  %s2245_s18 = smov 16  }
  0x66   :  { %81 = dma.hbm_to_vmem [thread:$0]  %s2975_s6, 4096, %s76_s13, [#allocation9], %s2244_s2, %s2244_s2, %s2245_s18  }
  0x67   :  { %s2246_s23 = smov [#allocation13]   ;;  %s2180_s14 = scalar_lea.hbm %s2979_s10, 2048 }
  0x68   :  { %s103_s25 = sshll.u32 %s2246_s23, 4  ;;  %p2181_p6 = scmp.ne.s32.totalorder %s2979_s10, %s2180_s14  ;;  %s104_s25 = int_to_ptr.vmem [resolvable:$true] %s103_s25 }
  0x69   :  { %p2184_p7 = scmp.lt.u32.totalorder %s2180_s14, %s2979_s10 }
  0x6b   :  { %p2186_p8 = pnand %p2184_p7, %p2181_p6 }
  0x6d   :  { %2189 = shalt.err (!%p2186_p8)
}
  0x6e   :  { %s2190_s16 = scalar_lea.vmem %s104_s25, 2048  ;;  %p2195_p10 = scmp.lt.s32.totalorder %s104_s25, %s104_s25 }
  0x6f   :  { %p2191_p9 = scmp.ne.s32.totalorder %s104_s25, %s2190_s16  ;;  %p2196_p11 = scmp.lt.s32.totalorder %s2190_s16, %s2190_s16 }
  0x71   :  { %p2197_p12 = por %p2196_p11, %p2195_p10 }
  0x73   :  { %p2198_p13 = pnand %p2197_p12, %p2191_p9 }
  0x75   :  { %2201 = shalt.err (!%p2198_p13)
}
  0x76   :  { %109 = dma.hbm_to_vmem [thread:$0]  %s2979_s10, 2048, %s104_s25, [#allocation12], %s2236_s1, %s2236_s1, %s2237_s22  }
  0x77   :  { %2224 = dma.done.wait [#allocation3], 128  }
  0x78   :  { %2225 = vsyncadd [#allocation3], 4294967168 }
  0x79   :  { %2226 = dma.done.wait [#allocation6], 4224  }
  0x7a   :  { %2227 = vsyncadd [#allocation6], 4294963072 }
  0x7b   :  { %2228 = dma.done.wait [#allocation9], 6144  }
  0x7c   :  { %2229 = vsyncadd [#allocation9], 4294961152 }
  0x7d   :  { %2230 = dma.done.wait [#allocation12], 6144  }
  0x7e   :  { %2231 = vsyncadd [#allocation12], 4294961152  ;;  %v2487_v0 = vld [vmem:[#allocation5] sm:$0xff]  ;;  %s2247_s8 = smov 120   ;;  %s2248_s30 = smov 104   ;;  %v207_v1 = vld [vmem:[#allocation7 + $0x8] sm:$0xff] }
  0x7f   :  { %143 = vrot.lane.b32.xlu0 %v2487_v0, %s2247_s8  ;;  %161 = vrot.lane.b32.xlu1 %v2487_v0, %s2248_s30  ;;  %v215_v2 = vld [vmem:[#allocation7 + $0x48] sm:$0xff]  ;;  %v206_v3 = vld [vmem:[#allocation7] sm:$0xff]  ;;  %v2982_v8 = vmov 0.0   ;;  %v209_v11 = vld [vmem:[#allocation7 + $0x18] sm:$0xff]  ;;  %s2250_s10 = smov 112   ;;  %s2251_s1 = smov 96  }
  0x80   :  { %v1724_v4 = vpack.c.bf16 %v215_v2, %v207_v1  ;;  %v214_v5 = vld [vmem:[#allocation7 + $0x40] sm:$0xff]  ;;  %v223_v6 = vld [vmem:[#allocation7 + $0x88] sm:$0xff]  ;;  %306 = vmatprep.mubr.f32.mxu0 %v2982_v8  ;;  %377 = vmatprep.mubr.f32.mxu1 %v2982_v8  ;;  %v217_v12 = vld [vmem:[#allocation7 + $0x58] sm:$0xff]  ;;  %s2252_s22 = smov 80   ;;  %s2253_s17 = smov 88   ;;  %vm238_vm0 = vcmask 261120  }
  0x81   :  { %v231_v7 = vld [vmem:[#allocation7 + $0xc8] sm:$0xff]  ;;  %v1726_v9 = vpack.c.bf16 %v214_v5, %v206_v3  ;;  %v222_v13 = vld [vmem:[#allocation7 + $0x80] sm:$0xff]  ;;  %v1732_v14 = vpack.c.bf16 %v217_v12, %v209_v11  ;;  %v208_v16 = vld [vmem:[#allocation7 + $0x10] sm:$0xff]  ;;  %s2254_s19 = smov 72   ;;  %vm135_vm1 = vcmask 64512   ;;  %v2255_v52 = vmov 1  }
  0x82   :  { %v1728_v10 = vpack.c.bf16 %v231_v7, %v223_v6  ;;  %1725 = vmatprep.subr.bf16.mxu0 %v1724_v4  ;;  %v230_v15 = vld [vmem:[#allocation7 + $0xc0] sm:$0xff]  ;;  %v216_v17 = vld [vmem:[#allocation7 + $0x50] sm:$0xff]  ;;  %v225_v19 = vld [vmem:[#allocation7 + $0x98] sm:$0xff]  ;;  %v136_v51 = vsel %vm135_vm1, %v2487_v0, 0.0  ;;  %1965 = vset.pattern.permute.xlu1 %v2255_v52  ;;  %v2256_v53 = vmov 0   ;;  %v2258_v11 = vmov 4  }
  0x83   :  { %152 = vrot.lane.b32.xlu0 %v2487_v0, %s2250_s10  ;;  %170 = vrot.lane.b32.xlu1 %v2487_v0, %s2251_s1  ;;  %v1734_v18 = vpack.c.bf16 %v216_v17, %v208_v16  ;;  %v233_v20 = vld [vmem:[#allocation7 + $0xd8] sm:$0xff]  ;;  %v211_v21 = vld [vmem:[#allocation7 + $0x28] sm:$0xff]  ;;  %v1730_v22 = vpack.c.bf16 %v230_v15, %v222_v13  ;;  %v224_v25 = vld [vmem:[#allocation7 + $0x90] sm:$0xff]  ;;  %v2259_v12 = vmov 3   ;;  %v2260_v13 = vmov 6  }
  0x84   :  { %1727 = vmatpush1.bf16.msra.mxu0 %v1726_v9  ;;  %1733 = vmatprep.subr.bf16.mxu1 %v1732_v14  ;;  %v1736_v23 = vpack.c.bf16 %v233_v20, %v225_v19  ;;  %v219_v24 = vld [vmem:[#allocation7 + $0x68] sm:$0xff]  ;;  %v232_v27 = vld [vmem:[#allocation7 + $0xd0] sm:$0xff]  ;;  %v210_v28 = vld [vmem:[#allocation7 + $0x20] sm:$0xff]  ;;  %v2261_v14 = vmov 5   ;;  %v2262_v15 = vmov 7   ;;  %v2263_v16 = vmov 8  }
  0x85   :  { %1729 = vmatprep.subr.bf16.mxu0 %v1728_v10  ;;  %1735 = vmatpush1.bf16.msra.mxu1 %v1734_v18  ;;  %v1740_v26 = vpack.c.bf16 %v219_v24, %v211_v21  ;;  %v218_v29 = vld [vmem:[#allocation7 + $0x60] sm:$0xff]  ;;  %v1738_v30 = vpack.c.bf16 %v232_v27, %v224_v25  ;;  %v227_v31 = vld [vmem:[#allocation7 + $0xa8] sm:$0xff]  ;;  %v213_v33 = vld [vmem:[#allocation7 + $0x38] sm:$0xff]  ;;  %v2257_v10 = vmov 2   ;;  %v2264_v17 = vmov 11  }
  0x86   :  { %1737 = vmatprep.subr.bf16.mxu1 %v1736_v23  ;;  %v235_v32 = vld [vmem:[#allocation7 + $0xe8] sm:$0xff]  ;;  %v133_v34 = vld [vmem:[#allocation2] sm:$0xff]  ;;  %v221_v35 = vld [vmem:[#allocation7 + $0x78] sm:$0xff]  ;;  %v1742_v36 = vpack.c.bf16 %v218_v29, %v210_v28  ;;  %1964 = vset.pattern.permute.xlu0 %v2256_v53  ;;  %vm2320_vm2 = vmmov 0  }
  0x87   :  { %188 = vrot.lane.b32.xlu1 %v2487_v0, %s2252_s22  ;;  %179 = vrot.lane.b32.xlu0 %v2487_v0, %s2253_s17  ;;  %v1748_v37 = vpack.c.bf16 %v221_v35, %v213_v33  ;;  %v212_v38 = vld [vmem:[#allocation7 + $0x30] sm:$0xff]  ;;  %v229_v40 = vld [vmem:[#allocation7 + $0xb8] sm:$0xff]  ;;  %v1744_v41 = vpack.c.bf16 %v235_v32, %v227_v31  ;;  %v226_v42 = vld [vmem:[#allocation7 + $0xa0] sm:$0xff] }
  0x88   :  { %1731 = vmatpush1.bf16.msra.mxu0 %v1730_v22  ;;  %v220_v39 = vld [vmem:[#allocation7 + $0x70] sm:$0xff]  ;;  %v234_v43 = vld [vmem:[#allocation7 + $0xe0] sm:$0xff]  ;;  %v237_v45 = vld [vmem:[#allocation7 + $0xf8] sm:$0xff] }
  0x89   :  { %1741 = vmatprep.subr.bf16.mxu0 %v1740_v26  ;;  %1739 = vmatpush1.bf16.msra.mxu1 %v1738_v30  ;;  %v1750_v44 = vpack.c.bf16 %v220_v39, %v212_v38  ;;  %v1752_v46 = vpack.c.bf16 %v237_v45, %v229_v40  ;;  %v228_v47 = vld [vmem:[#allocation7 + $0xb0] sm:$0xff]  ;;  %v1746_v49 = vpack.c.bf16 %v234_v43, %v226_v42  ;;  %v2265_v39 = vmov 9  }
  0x8a   :  { %1749 = vmatprep.subr.bf16.mxu1 %v1748_v37  ;;  %v236_v48 = vld [vmem:[#allocation7 + $0xf0] sm:$0xff]  ;;  %v2266_v40 = vmov 26  }
  0x8b   :  { %197 = vrot.lane.b32.xlu0 %v2487_v0, %s2254_s19  ;;  %1561 = vmatmul.mubr.msk.f32.vlgmr.msra.gmra.mrb[0].mxu0 %vm238_vm0, %v133_v34  ;;  %v1754_v50 = vpack.c.bf16 %v236_v48, %v228_v47  ;;  %v2268_v47 = vmov 32  }
  0x8c   :  { %1743 = vmatpush1.bf16.msra.mxu0 %v1742_v36  ;;  %1562 = vmatmul.mubr.msk.f32.vlgmr.msra.gmra.mrb[0].mxu1 %vm238_vm0, %v133_v34 }
  0x8d   :  { %1745 = vmatprep.subr.bf16.mxu0 %v1744_v41  ;;  %1751 = vmatpush1.bf16.msra.mxu1 %v1750_v44 }
  0x8e   :  { %448 = vmatprep.mubr.f32.mxu0 %v2982_v8  ;;  %1753 = vmatprep.subr.bf16.mxu1 %v1752_v46  ;;  %v2267_v46 = vmov 10  }
  0x8f   :  { %519 = vmatprep.mubr.f32.mxu1 %v2982_v8 }
  0x90   :  { %1747 = vmatpush1.bf16.msra.mxu0 %v1746_v49 }
  0x91   :  { %1755 = vmatpush1.bf16.msra.mxu1 %v1754_v50  ;;  %v2269_v50 = vmov 16  }
  0x93   :  { %1563 = vmatmul.mubr.msk.f32.vlgmr.msra.gmra.mrb[2].mxu0 %vm238_vm0, %v133_v34 }
  0x94   :  { %1564 = vmatmul.mubr.msk.f32.vlgmr.msra.gmra.mrb[2].mxu1 %vm238_vm0, %v133_v34 }
  0x95   :  { %1313 = vmatprep.mubr.f32.mxu1 %v2982_v8 }
  0xab   :  { %137 = vadd.xlane.f32.xlu1 %v136_v51  ;;  %v2270_v51 = vmov 27  }
  0xf1   :  { %v144_v54 = vpop.permute.xlu0 %143  ;;  %v162_v55 = vpop.permute.xlu1 %161 }
  0xf2   :  { %v146_v56 = vsel %vm135_vm1, %v144_v54, 0.0  ;;  %v164_v57 = vsel %vm135_vm1, %v162_v55, 0.0  ;;  %v2271_v54 = vmov 17   ;;  %v2272_v55 = vmov 14  }
  0xf3   :  { %147 = vadd.xlane.f32.xlu0 %v146_v56  ;;  %165 = vadd.xlane.f32.xlu1 %v164_v57  ;;  %v2273_v57 = vmov 24  }
  0xf5   :  { %v153_v58 = vpop.permute.xlu0 %152  ;;  %v171_v59 = vpop.permute.xlu1 %170 }
  0xf6   :  { %v155_v60 = vsel %vm135_vm1, %v153_v58, 0.0  ;;  %v173_v61 = vsel %vm135_vm1, %v171_v59, 0.0  ;;  %v2274_v58 = vmov 48  }
  0xf7   :  { %156 = vadd.xlane.f32.xlu0 %v155_v60  ;;  %v2275_v60 = vmov 29  }
  0xf9   :  { %v189_v62 = vpop.permute.xlu1 %188  ;;  %v180_v63 = vpop.permute.xlu0 %179 }
  0xfa   :  { %v182_v1 = vsel %vm135_vm1, %v180_v63, 0.0  ;;  %v191_v2 = vsel %vm135_vm1, %v189_v62, 0.0  ;;  %v2277_v63 = vmov 57  }
  0xfb   :  { %174 = vadd.xlane.f32.xlu0 %v173_v61  ;;  %183 = vadd.xlane.f32.xlu1 %v182_v1  ;;  %v2276_v61 = vmov 25   ;;  %v2278_v1 = vmov 18  }
  0xfd   :  { %v198_v3 = vpop.permute.xlu0 %197 }
  0xfe   :  { %v200_v4 = vsel %vm135_vm1, %v198_v3, 0.0  ;;  %v2279_v3 = vmov 12  }
  0xff   :  { %192 = vadd.xlane.f32.xlu0 %v191_v2  ;;  %201 = vadd.xlane.f32.xlu1 %v200_v4  ;;  %v2280_v4 = vmov 50  }
 0x138   :  { %v138_v5 = vpop.xlane.xlu1 %137 }
 0x139   :  { %v139_v6 = vadd.f32 1e-06, %v138_v5  ;;  %v2281_v5 = vmov 19  }
 0x13b   :  { %2028 = vrcp.f32 %v139_v6  ;;  %v2282_v6 = vmov 58  }
 0x145   :  { %v2029_v7 = vpop.eup %2028 }
 0x146   :  { %v141_v9 = vmul.f32 %v2029_v7, %v2487_v0  ;;  %v2283_v7 = vmov 33  }
 0x148   :  { %534 = vperm.xlu1 %1965, %v141_v9   ;;  %529 = vperm.xlu0 %1964, %v141_v9  }
 0x14c   :  { %1966 = vset.pattern.permute.xlu1 %v2257_v10  ;;  %1968 = vset.pattern.permute.xlu0 %v2258_v11  ;;  %v2285_v11 = vmov 13  }
 0x14d   :  { %540 = vperm.xlu1 %1966, %v141_v9   ;;  %552 = vperm.xlu0 %1968, %v141_v9  }
 0x151   :  { %1967 = vset.pattern.permute.xlu1 %v2259_v12  ;;  %1970 = vset.pattern.permute.xlu0 %v2260_v13  ;;  %v2286_v12 = vmov 59  }
 0x152   :  { %546 = vperm.xlu1 %1967, %v141_v9   ;;  %564 = vperm.xlu0 %1970, %v141_v9  }
 0x156   :  { %1969 = vset.pattern.permute.xlu1 %v2261_v14  ;;  %1971 = vset.pattern.permute.xlu0 %v2262_v15 }
 0x157   :  { %558 = vperm.xlu1 %1969, %v141_v9   ;;  %570 = vperm.xlu0 %1971, %v141_v9   ;;  %v2284_v9 = vmov 51  }
 0x15b   :  { %1972 = vset.pattern.permute.xlu1 %v2263_v16  ;;  %1977 = vset.pattern.permute.xlu0 %v2264_v17 }
 0x15e   :  { %v2515_v18 = vpop.f32.mrb[0].mxu0 }
 0x15f   :  { %v2517_v19 = vpop.f32.mrb[1].mxu0  ;;  %v2519_v20 = vpop.f32.mrb[0].mxu1 }
 0x160   :  { %v2521_v21 = vpop.f32.mrb[1].mxu1 }
 0x166   :  { %v2523_v22 = vpop.f32.mrb[2].mxu0 }
 0x167   :  { %v2525_v23 = vpop.f32.mrb[3].mxu0  ;;  %v2527_v24 = vpop.f32.mrb[2].mxu1 }
 0x168   :  { %v2529_v25 = vpop.f32.mrb[3].mxu1 }
 0x180   :  { %v148_v26 = vpop.xlane.xlu0 %147  ;;  %v166_v27 = vpop.xlane.xlu1 %165 }
 0x181   :  { %v149_v28 = vadd.f32 1e-06, %v148_v26  ;;  %v167_v29 = vadd.f32 1e-06, %v166_v27  ;;  %v2287_v27 = vmov 40  }
 0x183   :  { %2030 = vrcp.f32 %v149_v28  ;;  %v2288_v28 = vmov 46  }
 0x184   :  { %2032 = vrcp.f32 %v167_v29  ;;  %v157_v30 = vpop.xlane.xlu0 %156 }
 0x185   :  { %v158_v33 = vadd.f32 1e-06, %v157_v30 }
 0x188   :  { %v175_v31 = vpop.xlane.xlu0 %174  ;;  %v184_v43 = vpop.xlane.xlu1 %183 }
 0x189   :  { %v176_v32 = vadd.f32 1e-06, %v175_v31  ;;  %v185_v2 = vadd.f32 1e-06, %v184_v43 }
 0x18b   :  { %2034 = vrcp.f32 %v176_v32  ;;  %v2289_v32 = vmov 41  }
 0x18c   :  { %2036 = vrcp.f32 %v158_v33  ;;  %v193_v38 = vpop.xlane.xlu0 %192  ;;  %v202_v49 = vpop.xlane.xlu1 %201  ;;  %v2290_v33 = vmov 53  }
 0x18d   :  { %v2031_v34 = vpop.eup %2030  ;;  %v194_v41 = vadd.f32 1e-06, %v193_v38  ;;  %v203_v52 = vadd.f32 1e-06, %v202_v49 }
 0x18e   :  { %v2033_v35 = vpop.eup %2032  ;;  %v2532_v36 = vmul.f32 %v2031_v34, %v2487_v0 }
 0x18f   :  { %v2537_v37 = vmul.f32 %v2033_v35, %v2487_v0  ;;  %2038 = vrcp.f32 %v194_v41  ;;  %v2291_v41 = vmov 20  }
 0x190   :  { %577 = vperm.xlu1 %1972, %v2532_v36   ;;  %594 = vperm.xlu0 %1977, %v2532_v36   ;;  %2040 = vrcp.f32 %v203_v52  ;;  %v2293_v52 = vmov 34  }
 0x191   :  { %2042 = vrcp.f32 %v185_v2  ;;  %v935_v2 = vld [vmem:[#allocation8 + $0x10] sm:$0xff] }
 0x194   :  { %1973 = vset.pattern.permute.xlu1 %v2265_v39  ;;  %1982 = vset.pattern.permute.xlu0 %v2266_v40 }
 0x195   :  { %v2035_v42 = vpop.eup %2034  ;;  %582 = vperm.xlu1 %1973, %v2532_v36   ;;  %684 = vperm.xlu0 %1982, %v2537_v37  }
 0x196   :  { %v2542_v44 = vmul.f32 %v2035_v42, %v2487_v0  ;;  %v2037_v45 = vpop.eup %2036  ;;  %v2292_v42 = vmov 54  }
 0x197   :  { %v2547_v48 = vmul.f32 %v2037_v45, %v2487_v0 }
 0x199   :  { %1974 = vset.pattern.permute.xlu1 %v2267_v46  ;;  %1984 = vset.pattern.permute.xlu0 %v2268_v47  ;;  %v2039_v53 = vpop.eup %2038 }
 0x19a   :  { %588 = vperm.xlu1 %1974, %v2532_v36   ;;  %721 = vperm.xlu0 %1984, %v2542_v44   ;;  %v2554_v56 = vmul.f32 %v2039_v53, %v2487_v0  ;;  %v2041_v59 = vpop.eup %2040  ;;  %v2294_v53 = vmov 63  }
 0x19b   :  { %v2561_v62 = vmul.f32 %v2041_v59, %v2487_v0  ;;  %v2043_v10 = vpop.eup %2042  ;;  %v934_v59 = vld [vmem:[#allocation8 + $0x8] sm:$0xff] }
 0x19c   :  { %v2578_v15 = vmul.f32 %v2043_v10, %v2487_v0  ;;  %v2297_v10 = vmov 21  }
 0x19e   :  { %1975 = vset.pattern.permute.xlu1 %v2269_v50  ;;  %1987 = vset.pattern.permute.xlu0 %v2270_v51 }
 0x19f   :  { %625 = vperm.xlu1 %1975, %v2547_v48   ;;  %690 = vperm.xlu0 %1987, %v2537_v37  }
 0x1a3   :  { %1976 = vset.pattern.permute.xlu1 %v2271_v54  ;;  %1992 = vset.pattern.permute.xlu0 %v2272_v55  ;;  %v2619_v55 = vld [vmem:[%s2972_s3] ss:$0 sm:$0xff] }
 0x1a4   :  { %630 = vperm.xlu1 %1976, %v2547_v48   ;;  %612 = vperm.xlu0 %1992, %v2532_v36  }
 0x1a8   :  { %1978 = vset.pattern.permute.xlu1 %v2273_v57  ;;  %1997 = vset.pattern.permute.xlu0 %v2274_v58  ;;  %v933_v58 = vld [vmem:[#allocation8] sm:$0xff] }
 0x1a9   :  { %817 = vperm.xlu0 %1997, %v2554_v56   ;;  %673 = vperm.xlu1 %1978, %v2537_v37  }
 0x1ad   :  { %2000 = vset.pattern.permute.xlu0 %v2275_v60  ;;  %1979 = vset.pattern.permute.xlu1 %v2276_v61  ;;  %v2295_v60 = vmov 28  }
 0x1ae   :  { %702 = vperm.xlu0 %2000, %v2537_v37   ;;  %678 = vperm.xlu1 %1979, %v2537_v37  }
 0x1b2   :  { %2003 = vset.pattern.permute.xlu0 %v2277_v63  ;;  %1980 = vset.pattern.permute.xlu1 %v2278_v1  ;;  %v1756_v63 = vpack.c.bf16 %v934_v59, %v933_v58  ;;  %v2306_v59 = vmov 44  }
 0x1b3   :  { %636 = vperm.xlu1 %1980, %v2547_v48   ;;  %870 = vperm.xlu0 %2003, %v2561_v62  }
 0x1b4   :  { %1757 = vmatprep.subr.bf16.mxu0 %v1756_v63 }
 0x1b5   :  { %1759 = vmatpush3.bf16.msra.mxu0 %v1756_v63 }
 0x1b7   :  { %1981 = vset.pattern.permute.xlu1 %v2279_v3  ;;  %2006 = vset.pattern.permute.xlu0 %v2280_v4  ;;  %v936_v3 = vld [vmem:[#allocation8 + $0x18] sm:$0xff] }
 0x1b8   :  { %600 = vperm.xlu1 %1981, %v2532_v36   ;;  %828 = vperm.xlu0 %2006, %v2554_v56   ;;  %v1760_v4 = vpack.c.bf16 %v936_v3, %v935_v2  ;;  %v2307_v2 = vmov 23  }
 0x1ba   :  { %1761 = vmatprep.subr.bf16.mxu0 %v1760_v4 }
 0x1bb   :  { %1763 = vmatpush3.bf16.msra.mxu0 %v1760_v4 }
 0x1bc   :  { %1983 = vset.pattern.permute.xlu1 %v2281_v5  ;;  %2009 = vset.pattern.permute.xlu0 %v2282_v6  ;;  %v2296_v5 = vmov 42   ;;  %v937_v6 = vld [vmem:[#allocation8 + $0x20] sm:$0xff] }
 0x1bd   :  { %642 = vperm.xlu1 %1983, %v2547_v48   ;;  %876 = vperm.xlu0 %2009, %v2561_v62  }
 0x1c1   :  { %1985 = vset.pattern.permute.xlu1 %v2283_v7  ;;  %2012 = vset.pattern.permute.xlu0 %v2284_v9  ;;  %v938_v7 = vld [vmem:[#allocation8 + $0x28] sm:$0xff] }
 0x1c2   :  { %726 = vperm.xlu1 %1985, %v2542_v44   ;;  %834 = vperm.xlu0 %2012, %v2554_v56   ;;  %v1764_v9 = vpack.c.bf16 %v938_v7, %v937_v6  ;;  %v2308_v7 = vmov 37  }
 0x1c4   :  { %1765 = vmatprep.subr.bf16.mxu0 %v1764_v9 }
 0x1c5   :  { %1767 = vmatpush3.bf16.msra.mxu0 %v1764_v9 }
 0x1c6   :  { %1986 = vset.pattern.permute.xlu1 %v2285_v11  ;;  %2015 = vset.pattern.permute.xlu0 %v2286_v12  ;;  %v939_v11 = vld [vmem:[#allocation8 + $0x30] sm:$0xff]  ;;  %v940_v12 = vld [vmem:[#allocation8 + $0x38] sm:$0xff] }
 0x1c7   :  { %606 = vperm.xlu1 %1986, %v2532_v36   ;;  %882 = vperm.xlu0 %2015, %v2561_v62   ;;  %v2573_v13 = vpop.permute.xlu1 %534  ;;  %v2575_v14 = vpop.permute.xlu0 %529 }
 0x1c8   :  { %v532_v16 = vmul.f32 %v2575_v14, %v2515_v18  ;;  %v537_v17 = vmul.f32 %v2573_v13, %v2517_v19 }
 0x1ca   :  { %v538_v26 = vadd.f32 %v537_v17, %v532_v16  ;;  %v1768_v16 = vpack.c.bf16 %v940_v12, %v939_v11  ;;  %v2298_v17 = vmov 35  }
 0x1cb   :  { %1988 = vset.pattern.permute.xlu1 %v2287_v27  ;;  %2018 = vset.pattern.permute.xlu0 %v2288_v28  ;;  %v942_v27 = vld [vmem:[#allocation8 + $0x48] sm:$0xff] }
 0x1cc   :  { %769 = vperm.xlu1 %1988, %v2578_v15   ;;  %804 = vperm.xlu0 %2018, %v2578_v15   ;;  %v2586_v29 = vpop.permute.xlu1 %540  ;;  %v2588_v30 = vpop.permute.xlu0 %552 }
 0x1cd   :  { %v543_v0 = vmul.f32 %v2586_v29, %v2519_v20  ;;  %v555_v39 = vmul.f32 %v2588_v30, %v2523_v22  ;;  %1769 = vmatprep.subr.bf16.mxu0 %v1768_v16 }
 0x1ce   :  { %1771 = vmatpush3.bf16.msra.mxu0 %v1768_v16  ;;  %v2309_v16 = vmov 31  }
 0x1cf   :  { %v544_v31 = vadd.f32 %v543_v0, %v538_v26  ;;  %v941_v26 = vld [vmem:[#allocation8 + $0x40] sm:$0xff]  ;;  %v943_v0 = vld [vmem:[#allocation8 + $0x50] sm:$0xff] }
 0x1d0   :  { %1989 = vset.pattern.permute.xlu1 %v2289_v32  ;;  %2021 = vset.pattern.permute.xlu0 %v2290_v33  ;;  %v1772_v28 = vpack.c.bf16 %v942_v27, %v941_v26  ;;  %v2299_v32 = vmov 49   ;;  %v2310_v26 = vmov 45  }
 0x1d1   :  { %774 = vperm.xlu1 %1989, %v2578_v15   ;;  %846 = vperm.xlu0 %2021, %v2554_v56   ;;  %v2594_v34 = vpop.permute.xlu1 %546  ;;  %v2596_v35 = vpop.permute.xlu0 %564 }
 0x1d2   :  { %3005 = vst [vmem:[#allocation20_spill] sm:$0xff] %v2596_v35  ;;  %v549_v38 = vmul.f32 %v2594_v34, %v2521_v21  ;;  %v567_v49 = vmul.f32 %v2596_v35, %v2527_v24  ;;  %1773 = vmatprep.subr.bf16.mxu0 %v1772_v28 }
 0x1d3   :  { %1775 = vmatpush3.bf16.msra.mxu0 %v1772_v28 }
 0x1d4   :  { %v550_v40 = vadd.f32 %v549_v38, %v544_v31  ;;  %v944_v31 = vld [vmem:[#allocation8 + $0x58] sm:$0xff]  ;;  %v945_v38 = vld [vmem:[#allocation8 + $0x60] sm:$0xff] }
 0x1d5   :  { %1990 = vset.pattern.permute.xlu1 %v2291_v41  ;;  %2024 = vset.pattern.permute.xlu0 %v2292_v42  ;;  %v1776_v33 = vpack.c.bf16 %v944_v31, %v943_v0  ;;  %v2300_v41 = vmov 15   ;;  %v947_v42 = vld [vmem:[#allocation8 + $0x70] sm:$0xff] }
 0x1d6   :  { %648 = vperm.xlu1 %1990, %v2547_v48   ;;  %852 = vperm.xlu0 %2024, %v2554_v56   ;;  %v2604_v43 = vpop.permute.xlu1 %558  ;;  %v2606_v45 = vpop.permute.xlu0 %570  ;;  %v556_v46 = vadd.f32 %v555_v39, %v550_v40  ;;  %v946_v39 = vld [vmem:[#allocation8 + $0x68] sm:$0xff] }
 0x1d7   :  { %3006 = vst [vmem:[#allocation21_spill] sm:$0xff] %v2606_v45  ;;  %v561_v47 = vmul.f32 %v2604_v43, %v2525_v23  ;;  %v573_v51 = vmul.f32 %v2606_v45, %v2529_v25  ;;  %1777 = vmatprep.subr.bf16.mxu0 %v1776_v33  ;;  %v1780_v40 = vpack.c.bf16 %v946_v39, %v945_v38 }
 0x1d8   :  { %1779 = vmatpush3.bf16.msra.mxu0 %v1776_v33 }
 0x1d9   :  { %v562_v50 = vadd.f32 %v561_v47, %v556_v46  ;;  %1781 = vmatprep.subr.bf16.mxu0 %v1780_v40  ;;  %v948_v46 = vld [vmem:[#allocation8 + $0x78] sm:$0xff] }
 0x1da   :  { %1991 = vset.pattern.permute.xlu1 %v2293_v52  ;;  %2027 = vset.pattern.permute.xlu0 %v2294_v53  ;;  %v1784_v47 = vpack.c.bf16 %v948_v46, %v947_v42  ;;  %v2305_v53 = vmov 30   ;;  %v2312_v46 = vmov 52  }
 0x1db   :  { %732 = vperm.xlu1 %1991, %v2542_v44   ;;  %906 = vperm.xlu0 %2027, %v2561_v62   ;;  %v568_v54 = vadd.f32 %v567_v49, %v562_v50  ;;  %v2301_v49 = vmov 43   ;;  %v2302_v50 = vmov 56  }
 0x1dc   :  { %1783 = vmatpush3.bf16.msra.mxu0 %v1780_v40 }
 0x1dd   :  { %v574_v57 = vadd.f32 %v573_v51, %v568_v54  ;;  %1785 = vmatprep.subr.bf16.mxu0 %v1784_v47  ;;  %v2303_v51 = vmov 22  }
 0x1df   :  { %1993 = vset.pattern.permute.xlu1 %v2295_v60  ;;  %v917_v61 = vadd.f32 %v2619_v55, %v574_v57 }
 0x1e0   :  { %696 = vperm.xlu1 %1993, %v2537_v37   ;;  %1787 = vmatpush3.bf16.msra.mxu0 %v1784_v47 }
 0x1e1   :  { %v918_v1 = vmax.f32 %v917_v61, 0.0 }
 0x1e3   :  { %1677 = vmatprep.mubr.f32.mxu0 %v918_v1 }
 0x1e4   :  { %1994 = vset.pattern.permute.xlu1 %v2296_v5 }
 0x1e5   :  { %780 = vperm.xlu1 %1994, %v2578_v15  }
 0x1e9   :  { %1995 = vset.pattern.permute.xlu1 %v2297_v10 }
 0x1ea   :  { %654 = vperm.xlu1 %1995, %v2547_v48  }
 0x1ee   :  { %1996 = vset.pattern.permute.xlu1 %v2298_v17 }
 0x1ef   :  { %738 = vperm.xlu1 %1996, %v2542_v44  }
 0x1f3   :  { %1998 = vset.pattern.permute.xlu1 %v2299_v32  ;;  %v2311_v32 = vmov 38  }
 0x1f4   :  { %822 = vperm.xlu1 %1998, %v2554_v56  }
 0x1f8   :  { %1999 = vset.pattern.permute.xlu1 %v2300_v41 }
 0x1f9   :  { %618 = vperm.xlu1 %1999, %v2532_v36   ;;  %v2304_v36 = vmov 36  }
 0x1fd   :  { %2001 = vset.pattern.permute.xlu1 %v2301_v49 }
 0x1fe   :  { %786 = vperm.xlu1 %2001, %v2578_v15  }
 0x202   :  { %2002 = vset.pattern.permute.xlu1 %v2302_v50 }
 0x203   :  { %865 = vperm.xlu1 %2002, %v2561_v62  }
 0x207   :  { %2004 = vset.pattern.permute.xlu1 %v2303_v51 }
 0x208   :  { %660 = vperm.xlu1 %2004, %v2547_v48  }
 0x20c   :  { %2005 = vset.pattern.permute.xlu1 %v2304_v36  ;;  %v2313_v36 = vmov 60  }
 0x20d   :  { %744 = vperm.xlu1 %2005, %v2542_v44  }
 0x20f   :  { %v2632_v52 = vpop.permute.xlu1 %577  ;;  %v2642_v61 = vpop.permute.xlu0 %594 }
 0x210   :  { %v580_v57 = vmul.f32 %v2632_v52, %v2515_v18  ;;  %v597_v3 = vmul.f32 %v2642_v61, %v2521_v21 }
 0x211   :  { %2007 = vset.pattern.permute.xlu1 %v2305_v53 }
 0x212   :  { %708 = vperm.xlu1 %2007, %v2537_v37  }
 0x214   :  { %v2635_v54 = vpop.permute.xlu1 %582  ;;  %v2660_v12 = vpop.permute.xlu0 %684 }
 0x215   :  { %v585_v58 = vmul.f32 %v2635_v54, %v2517_v19 }
 0x216   :  { %2008 = vset.pattern.permute.xlu1 %v2306_v59  ;;  %v2314_v59 = vmov 39  }
 0x217   :  { %v586_v60 = vadd.f32 %v585_v58, %v580_v57  ;;  %792 = vperm.xlu1 %2008, %v2578_v15  }
 0x219   :  { %v2644_v63 = vpop.permute.xlu1 %588  ;;  %v2665_v27 = vpop.permute.xlu0 %721 }
 0x21a   :  { %v591_v1 = vmul.f32 %v2644_v63, %v2519_v20 }
 0x21b   :  { %2010 = vset.pattern.permute.xlu1 %v2307_v2 }
 0x21c   :  { %v592_v4 = vadd.f32 %v591_v1, %v586_v60  ;;  %666 = vperm.xlu1 %2010, %v2547_v48   ;;  %v724_v1 = vmul.f32 %v2665_v27, %v2515_v18 }
 0x21e   :  { %v2651_v5 = vpop.permute.xlu1 %625  ;;  %v598_v6 = vadd.f32 %v597_v3, %v592_v4  ;;  %v2677_v38 = vpop.permute.xlu0 %690  ;;  %v2315_v4 = vmov 47  }
 0x21f   :  { %v628_v10 = vmul.f32 %v2651_v5, %v2515_v18  ;;  %v693_v39 = vmul.f32 %v2677_v38, %v2521_v21 }
 0x220   :  { %2011 = vset.pattern.permute.xlu1 %v2308_v7 }
 0x221   :  { %750 = vperm.xlu1 %2011, %v2542_v44  }
 0x223   :  { %v2654_v9 = vpop.permute.xlu1 %630  ;;  %v2703_v7 = vpop.permute.xlu0 %612 }
 0x224   :  { %v633_v11 = vmul.f32 %v2654_v9, %v2517_v19  ;;  %3007 = vst [vmem:[#allocation22_spill] sm:$0xff] %v2703_v7 }
 0x225   :  { %2013 = vset.pattern.permute.xlu1 %v2309_v16  ;;  %v615_v16 = vmul.f32 %v2703_v7, %v2527_v24 }
 0x226   :  { %v634_v48 = vadd.f32 %v633_v11, %v628_v10  ;;  %714 = vperm.xlu1 %2013, %v2537_v37   ;;  %v687_v37 = vmul.f32 %v2660_v12, %v2519_v20  ;;  %v2316_v11 = vmov 61  }
 0x228   :  { %v2663_v17 = vpop.permute.xlu1 %673 }
 0x229   :  { %v676_v0 = vmul.f32 %v2663_v17, %v2515_v18 }
 0x22a   :  { %2014 = vset.pattern.permute.xlu1 %v2310_v26 }
 0x22b   :  { %798 = vperm.xlu1 %2014, %v2578_v15  }
 0x22d   :  { %v2668_v28 = vpop.permute.xlu1 %678 }
 0x22e   :  { %v681_v31 = vmul.f32 %v2668_v28, %v2517_v19 }
 0x22f   :  { %2016 = vset.pattern.permute.xlu1 %v2311_v32 }
 0x230   :  { %v682_v33 = vadd.f32 %v681_v31, %v676_v0  ;;  %756 = vperm.xlu1 %2016, %v2542_v44   ;;  %v2317_v31 = vmov 62  }
 0x232   :  { %v688_v40 = vadd.f32 %v687_v37, %v682_v33  ;;  %v2681_v41 = vpop.permute.xlu1 %636  ;;  %v2318_v33 = vmov 55  }
 0x233   :  { %v639_v42 = vmul.f32 %v2681_v41, %v2519_v20 }
 0x234   :  { %2017 = vset.pattern.permute.xlu1 %v2312_v46  ;;  %v694_v47 = vadd.f32 %v693_v39, %v688_v40 }
 0x235   :  { %v640_v49 = vadd.f32 %v639_v42, %v634_v48  ;;  %840 = vperm.xlu1 %2017, %v2554_v56  }
 0x237   :  { %v2686_v50 = vpop.permute.xlu1 %600 }
 0x238   :  { %v603_v51 = vmul.f32 %v2686_v50, %v2523_v22 }
 0x239   :  { %2019 = vset.pattern.permute.xlu1 %v2313_v36 }
 0x23a   :  { %v604_v53 = vadd.f32 %v603_v51, %v598_v6  ;;  %888 = vperm.xlu1 %2019, %v2561_v62  }
 0x23c   :  { %v2691_v57 = vpop.permute.xlu1 %642 }
 0x23d   :  { %v645_v58 = vmul.f32 %v2691_v57, %v2521_v21 }
 0x23e   :  { %2020 = vset.pattern.permute.xlu1 %v2314_v59 }
 0x23f   :  { %v646_v60 = vadd.f32 %v645_v58, %v640_v49  ;;  %762 = vperm.xlu1 %2020, %v2542_v44  }
 0x241   :  { %v2698_v2 = vpop.permute.xlu1 %726 }
 0x242   :  { %v729_v3 = vmul.f32 %v2698_v2, %v2517_v19 }
 0x243   :  { %2022 = vset.pattern.permute.xlu1 %v2315_v4 }
 0x244   :  { %v730_v6 = vadd.f32 %v729_v3, %v724_v1  ;;  %810 = vperm.xlu1 %2022, %v2578_v15  }
 0x246   :  { %v2705_v10 = vpop.permute.xlu1 %606 }
 0x247   :  { %v609_v44 = vmul.f32 %v2705_v10, %v2525_v23 }
 0x248   :  { %2023 = vset.pattern.permute.xlu1 %v2316_v11 }
 0x249   :  { %v610_v48 = vadd.f32 %v609_v44, %v604_v53  ;;  %894 = vperm.xlu1 %2023, %v2561_v62  }
 0x24b   :  { %v2712_v26 = vpop.permute.xlu1 %769  ;;  %v616_v0 = vadd.f32 %v615_v16, %v610_v48 }
 0x24c   :  { %v772_v32 = vmul.f32 %v2712_v26, %v2515_v18 }
 0x24d   :  { %2025 = vset.pattern.permute.xlu1 %v2317_v31 }
 0x24e   :  { %900 = vperm.xlu1 %2025, %v2561_v62   ;;  %v2726_v62 = vpop.permute.xlu0 %817 }
 0x250   :  { %v2715_v15 = vpop.permute.xlu1 %774 }
 0x251   :  { %v777_v37 = vmul.f32 %v2715_v15, %v2517_v19 }
 0x252   :  { %2026 = vset.pattern.permute.xlu1 %v2318_v33  ;;  %v2732_v53 = vpop.permute.xlu0 %702 }
 0x253   :  { %v778_v39 = vadd.f32 %v777_v37, %v772_v32  ;;  %858 = vperm.xlu1 %2026, %v2554_v56   ;;  %v705_v59 = vmul.f32 %v2732_v53, %v2525_v23 }
 0x255   :  { %v2722_v40 = vpop.permute.xlu1 %648 }
 0x256   :  { %3008 = vst [vmem:[#allocation23_spill] sm:$0xff] %v2722_v40  ;;  %v651_v42 = vmul.f32 %v2722_v40, %v2523_v22  ;;  %v2742_v4 = vpop.permute.xlu0 %870 }
 0x258   :  { %v652_v46 = vadd.f32 %v651_v42, %v646_v60 }
 0x25a   :  { %v2728_v49 = vpop.permute.xlu1 %732  ;;  %v2750_v48 = vpop.permute.xlu0 %828 }
 0x25b   :  { %v735_v51 = vmul.f32 %v2728_v49, %v2519_v20 }
 0x25d   :  { %v736_v36 = vadd.f32 %v735_v51, %v730_v6 }
 0x25e   :  { %v2756_v37 = vpop.permute.xlu0 %876 }
 0x25f   :  { %v2734_v58 = vpop.permute.xlu1 %696 }
 0x260   :  { %3009 = vst [vmem:[#allocation24_spill] sm:$0xff] %v2734_v58  ;;  %v699_v56 = vmul.f32 %v2734_v58, %v2523_v22 }
 0x262   :  { %v700_v1 = vadd.f32 %v699_v56, %v694_v47  ;;  %v831_v56 = vmul.f32 %v2750_v48, %v2519_v20 }
 0x264   :  { %v2740_v60 = vpop.permute.xlu1 %780  ;;  %v706_v3 = vadd.f32 %v705_v59, %v700_v1  ;;  %v2766_v59 = vpop.permute.xlu0 %834 }
 0x265   :  { %v783_v44 = vmul.f32 %v2740_v60, %v2519_v20  ;;  %v837_v1 = vmul.f32 %v2766_v59, %v2521_v21 }
 0x267   :  { %v784_v6 = vadd.f32 %v783_v44, %v778_v39  ;;  %v820_v39 = vmul.f32 %v2726_v62, %v2515_v18 }
 0x269   :  { %v2746_v11 = vpop.permute.xlu1 %654 }
 0x26a   :  { %v657_v16 = vmul.f32 %v2746_v11, %v2525_v23 }
 0x26c   :  { %v658_v31 = vadd.f32 %v657_v16, %v652_v46 }
 0x26e   :  { %v2752_v32 = vpop.permute.xlu1 %738 }
 0x26f   :  { %v741_v47 = vmul.f32 %v2752_v32, %v2521_v21 }
 0x271   :  { %v742_v33 = vadd.f32 %v741_v47, %v736_v36 }
 0x273   :  { %v2758_v42 = vpop.permute.xlu1 %822 }
 0x274   :  { %v825_v51 = vmul.f32 %v2758_v42, %v2517_v19 }
 0x276   :  { %v826_v46 = vadd.f32 %v825_v51, %v820_v39 }
 0x278   :  { %v832_v44 = vadd.f32 %v831_v56, %v826_v46  ;;  %v2770_v16 = vpop.permute.xlu1 %618  ;;  %v873_v56 = vmul.f32 %v2742_v4, %v2517_v19 }
 0x279   :  { %3010 = vst [vmem:[#allocation25_spill] sm:$0xff] %v2770_v16  ;;  %v621_v36 = vmul.f32 %v2770_v16, %v2529_v25 }
 0x27a   :  { %v838_v47 = vadd.f32 %v837_v1, %v832_v44  ;;  %v2787_v1 = vpop.permute.xlu0 %882 }
 0x27b   :  { %v622_v8 = vadd.f32 %v621_v36, %v616_v0  ;;  %v879_v0 = vmul.f32 %v2756_v37, %v2519_v20  ;;  %v885_v44 = vmul.f32 %v2787_v1, %v2521_v21 }
 0x27d   :  { %v919_v7 = vadd.f32 %v2619_v55, %v622_v8  ;;  %v2775_v35 = vpop.permute.xlu1 %786 }
 0x27e   :  { %v789_v39 = vmul.f32 %v2775_v35, %v2521_v21  ;;  %v2820_v16 = vpop.permute.xlu0 %804 }
 0x27f   :  { %v920_v51 = vmax.f32 %v919_v7, 0.0  ;;  %3017 = vst [vmem:[#allocation32_spill] sm:$0xff] %v2820_v16 }
 0x280   :  { %v790_v45 = vadd.f32 %v789_v39, %v784_v6 }
 0x281   :  { %1678 = vmatmul.mubr.f32.vlgmr.msra.gmra.mrb[4].mxu0 %v920_v51 }
 0x282   :  { %v2779_v58 = vpop.permute.xlu1 %865 }
 0x283   :  { %v868_v46 = vmul.f32 %v2779_v58, %v2515_v18 }
 0x285   :  { %v874_v8 = vadd.f32 %v873_v56, %v868_v46 }
 0x287   :  { %v880_v7 = vadd.f32 %v879_v0, %v874_v8  ;;  %v2791_v6 = vpop.permute.xlu1 %660 }
 0x288   :  { %3011 = vst [vmem:[#allocation26_spill] sm:$0xff] %v2791_v6  ;;  %v663_v36 = vmul.f32 %v2791_v6, %v2527_v24 }
 0x289   :  { %v886_v39 = vadd.f32 %v885_v44, %v880_v7 }
 0x28a   :  { %v664_v19 = vadd.f32 %v663_v36, %v658_v31 }
 0x28c   :  { %v2795_v51 = vpop.permute.xlu1 %744 }
 0x28d   :  { %3012 = vst [vmem:[#allocation27_spill] sm:$0xff] %v2795_v51  ;;  %v747_v18 = vmul.f32 %v2795_v51, %v2523_v22 }
 0x28f   :  { %v748_v20 = vadd.f32 %v747_v18, %v742_v33 }
 0x291   :  { %v2799_v56 = vpop.permute.xlu1 %708 }
 0x292   :  { %3013 = vst [vmem:[#allocation28_spill] sm:$0xff] %v2799_v56  ;;  %v711_v46 = vmul.f32 %v2799_v56, %v2527_v24 }
 0x294   :  { %v712_v21 = vadd.f32 %v711_v46, %v706_v3 }
 0x296   :  { %v2803_v0 = vpop.permute.xlu1 %792 }
 0x297   :  { %3014 = vst [vmem:[#allocation29_spill] sm:$0xff] %v2803_v0  ;;  %v795_v8 = vmul.f32 %v2803_v0, %v2523_v22 }
 0x299   :  { %v796_v6 = vadd.f32 %v795_v8, %v790_v45 }
 0x29b   :  { %v2807_v44 = vpop.permute.xlu1 %666 }
 0x29c   :  { %3015 = vst [vmem:[#allocation30_spill] sm:$0xff] %v2807_v44  ;;  %v669_v31 = vmul.f32 %v2807_v44, %v2529_v25 }
 0x29e   :  { %v670_v7 = vadd.f32 %v669_v31, %v664_v19 }
 0x2a0   :  { %v2811_v36 = vpop.permute.xlu1 %750  ;;  %v921_v33 = vadd.f32 %v2619_v55, %v670_v7 }
 0x2a1   :  { %v753_v18 = vmul.f32 %v2811_v36, %v2525_v23 }
 0x2a2   :  { %v922_v3 = vmax.f32 %v921_v33, 0.0 }
 0x2a3   :  { %v754_v46 = vadd.f32 %v753_v18, %v748_v20  ;;  %v807_v20 = vmul.f32 %v2820_v16, %v2527_v24 }
 0x2a4   :  { %1680 = vmatprep.mubr.f32.mxu0 %v922_v3 }
 0x2a5   :  { %v2816_v56 = vpop.permute.xlu1 %714 }
 0x2a6   :  { %3016 = vst [vmem:[#allocation31_spill] sm:$0xff] %v2816_v56  ;;  %v717_v45 = vmul.f32 %v2816_v56, %v2529_v25  ;;  %v2831_v56 = vpop.permute.xlu0 %846 }
 0x2a8   :  { %v718_v8 = vadd.f32 %v717_v45, %v712_v21 }
 0x2aa   :  { %v2822_v44 = vpop.permute.xlu1 %798  ;;  %v923_v19 = vadd.f32 %v2619_v55, %v718_v8 }
 0x2ab   :  { %v801_v31 = vmul.f32 %v2822_v44, %v2525_v23 }
 0x2ac   :  { %v924_v7 = vmax.f32 %v923_v19, 0.0  ;;  %v2839_v19 = vpop.permute.xlu0 %852 }
 0x2ad   :  { %v802_v33 = vadd.f32 %v801_v31, %v796_v6  ;;  %3020 = vst [vmem:[#allocation35_spill] sm:$0xff] %v2839_v19  ;;  %v849_v6 = vmul.f32 %v2831_v56, %v2525_v23 }
 0x2ae   :  { %1681 = vmatmul.mubr.f32.gmra.mrb[6].mxu0 %v924_v7  ;;  %v855_v7 = vmul.f32 %v2839_v19, %v2527_v24 }
 0x2af   :  { %v2829_v18 = vpop.permute.xlu1 %756  ;;  %v808_v3 = vadd.f32 %v807_v20, %v802_v33 }
 0x2b0   :  { %3018 = vst [vmem:[#allocation33_spill] sm:$0xff] %v2829_v18  ;;  %v759_v21 = vmul.f32 %v2829_v18, %v2527_v24 }
 0x2b2   :  { %v760_v45 = vadd.f32 %v759_v21, %v754_v46 }
 0x2b4   :  { %v2835_v0 = vpop.permute.xlu1 %840 }
 0x2b5   :  { %3019 = vst [vmem:[#allocation34_spill] sm:$0xff] %v2835_v0  ;;  %v843_v8 = vmul.f32 %v2835_v0, %v2523_v22 }
 0x2b7   :  { %v844_v31 = vadd.f32 %v843_v8, %v838_v47 }
 0x2b9   :  { %v850_v20 = vadd.f32 %v849_v6, %v844_v31  ;;  %v2845_v33 = vpop.permute.xlu1 %888 }
 0x2ba   :  { %v891_v46 = vmul.f32 %v2845_v33, %v2523_v22 }
 0x2bb   :  { %v856_v21 = vadd.f32 %v855_v7, %v850_v20 }
 0x2bc   :  { %v892_v16 = vadd.f32 %v891_v46, %v886_v39 }
 0x2be   :  { %v2849_v18 = vpop.permute.xlu1 %762 }
 0x2bf   :  { %3021 = vst [vmem:[#allocation36_spill] sm:$0xff] %v2849_v18  ;;  %v765_v0 = vmul.f32 %v2849_v18, %v2529_v25  ;;  %v1324_v18 = vld [vmem:[#allocation11 + $0x10] sm:$0xff] }
 0x2c1   :  { %v766_v51 = vadd.f32 %v765_v0, %v760_v45  ;;  %v2863_v0 = vpop.permute.xlu0 %906 }
 0x2c2   :  { %3024 = vst [vmem:[#allocation39_spill] sm:$0xff] %v2863_v0 }
 0x2c3   :  { %v2853_v40 = vpop.permute.xlu1 %810  ;;  %v925_v47 = vadd.f32 %v2619_v55, %v766_v51 }
 0x2c4   :  { %3022 = vst [vmem:[#allocation37_spill] sm:$0xff] %v2853_v40  ;;  %v813_v8 = vmul.f32 %v2853_v40, %v2529_v25  ;;  %v1232_v40 = vld [vmem:[#allocation10 + $0xd8] sm:$0xff] }
 0x2c5   :  { %v926_v6 = vmax.f32 %v925_v47, 0.0 }
 0x2c6   :  { %v814_v31 = vadd.f32 %v813_v8, %v808_v3  ;;  %v909_v3 = vmul.f32 %v2863_v0, %v2529_v25 }
 0x2c7   :  { %1683 = vmatprep.mubr.f32.mxu0 %v926_v6 }
 0x2c8   :  { %v2858_v19 = vpop.permute.xlu1 %894  ;;  %v927_v22 = vadd.f32 %v2619_v55, %v814_v31 }
 0x2c9   :  { %3023 = vst [vmem:[#allocation38_spill] sm:$0xff] %v2858_v19  ;;  %v897_v39 = vmul.f32 %v2858_v19, %v2525_v23 }
 0x2ca   :  { %v928_v7 = vmax.f32 %v927_v22, 0.0 }
 0x2cb   :  { %v898_v20 = vadd.f32 %v897_v39, %v892_v16 }
 0x2cc   :  { %1684 = vmatmul.mubr.f32.gmra.mrb[8].mxu0 %v928_v7  ;;  %v1208_v7 = vld [vmem:[#allocation10 + $0x18] sm:$0xff] }
 0x2cd   :  { %v2865_v45 = vpop.permute.xlu1 %900 }
 0x2ce   :  { %3025 = vst [vmem:[#allocation40_spill] sm:$0xff] %v2865_v45  ;;  %v903_v51 = vmul.f32 %v2865_v45, %v2527_v24  ;;  %v1206_v24 = vld [vmem:[#allocation10 + $0x8] sm:$0xff]  ;;  %v1205_v45 = vld [vmem:[#allocation10] sm:$0xff] }
 0x2cf   :  { %v1788_v0 = vpack.c.bf16 %v1208_v7, %v1206_v24  ;;  %v1218_v24 = vld [vmem:[#allocation10 + $0x68] sm:$0xff]  ;;  %v1220_v7 = vld [vmem:[#allocation10 + $0x78] sm:$0xff] }
 0x2d0   :  { %v904_v46 = vadd.f32 %v903_v51, %v898_v20  ;;  %v1207_v20 = vld [vmem:[#allocation10 + $0x10] sm:$0xff] }
 0x2d1   :  { %v1790_v51 = vpack.c.bf16 %v1207_v20, %v1205_v45  ;;  %1789 = vmatprep.subr.bf16.mxu1 %v1788_v0  ;;  %v1217_v45 = vld [vmem:[#allocation10 + $0x60] sm:$0xff]  ;;  %v1800_v0 = vpack.c.bf16 %v1220_v7, %v1218_v24  ;;  %v1219_v20 = vld [vmem:[#allocation10 + $0x70] sm:$0xff] }
 0x2d2   :  { %v910_v47 = vadd.f32 %v909_v3, %v904_v46  ;;  %v2871_v8 = vpop.permute.xlu1 %858  ;;  %v1210_v3 = vld [vmem:[#allocation10 + $0x28] sm:$0xff]  ;;  %v1212_v46 = vld [vmem:[#allocation10 + $0x38] sm:$0xff]  ;;  %v1229_v7 = vld [vmem:[#allocation10 + $0xc0] sm:$0xff] }
 0x2d3   :  { %3026 = vst [vmem:[#allocation41_spill] sm:$0xff] %v2871_v8  ;;  %v861_v23 = vmul.f32 %v2871_v8, %v2529_v25  ;;  %1791 = vmatpush1.bf16.msra.mxu1 %v1790_v51  ;;  %v1792_v25 = vpack.c.bf16 %v1212_v46, %v1210_v3  ;;  %v1222_v51 = vld [vmem:[#allocation10 + $0x88] sm:$0xff]  ;;  %v1224_v3 = vld [vmem:[#allocation10 + $0x98] sm:$0xff]  ;;  %v1802_v46 = vpack.c.bf16 %v1219_v20, %v1217_v45  ;;  %v1231_v45 = vld [vmem:[#allocation10 + $0xd0] sm:$0xff] }
 0x2d4   :  { %v931_v16 = vadd.f32 %v2619_v55, %v910_v47  ;;  %v1804_v8 = vpack.c.bf16 %v1224_v3, %v1222_v51  ;;  %v1234_v20 = vld [vmem:[#allocation10 + $0xe8] sm:$0xff]  ;;  %v1236_v51 = vld [vmem:[#allocation10 + $0xf8] sm:$0xff] }
 0x2d5   :  { %v862_v6 = vadd.f32 %v861_v23, %v856_v21  ;;  %v1209_v21 = vld [vmem:[#allocation10 + $0x20] sm:$0xff]  ;;  %v1211_v23 = vld [vmem:[#allocation10 + $0x30] sm:$0xff]  ;;  %1793 = vmatprep.subr.bf16.mxu1 %v1792_v25  ;;  %v1816_v3 = vpack.c.bf16 %v1236_v51, %v1234_v20  ;;  %v1327_v51 = vld [vmem:[#allocation11 + $0x28] sm:$0xff] }
 0x2d6   :  { %v932_v39 = vmax.f32 %v931_v16, 0.0  ;;  %v1794_v47 = vpack.c.bf16 %v1211_v23, %v1209_v21  ;;  %v1221_v21 = vld [vmem:[#allocation10 + $0x80] sm:$0xff]  ;;  %v1223_v25 = vld [vmem:[#allocation10 + $0x90] sm:$0xff]  ;;  %v1226_v23 = vld [vmem:[#allocation10 + $0xa8] sm:$0xff] }
 0x2d7   :  { %v929_v31 = vadd.f32 %v2619_v55, %v862_v6  ;;  %v1214_v55 = vld [vmem:[#allocation10 + $0x48] sm:$0xff]  ;;  %v1216_v6 = vld [vmem:[#allocation10 + $0x58] sm:$0xff]  ;;  %v1326_v20 = vld [vmem:[#allocation11 + $0x20] sm:$0xff] }
 0x2d8   :  { %1795 = vmatpush1.bf16.msra.mxu1 %v1794_v47  ;;  %v1796_v16 = vpack.c.bf16 %v1216_v6, %v1214_v55  ;;  %v1228_v47 = vld [vmem:[#allocation10 + $0xb8] sm:$0xff]  ;;  %v1806_v55 = vpack.c.bf16 %v1223_v25, %v1221_v21  ;;  %v1235_v21 = vld [vmem:[#allocation10 + $0xf0] sm:$0xff]  ;;  %v1338_v25 = vld [vmem:[#allocation11 + $0x80] sm:$0xff] }
 0x2d9   :  { %v930_v22 = vmax.f32 %v929_v31, 0.0  ;;  %v1213_v31 = vld [vmem:[#allocation10 + $0x40] sm:$0xff]  ;;  %v1808_v6 = vpack.c.bf16 %v1228_v47, %v1226_v23  ;;  %v1339_v23 = vld [vmem:[#allocation11 + $0x88] sm:$0xff] }
 0x2da   :  { %1797 = vmatprep.subr.bf16.mxu1 %v1796_v16  ;;  %v1225_v16 = vld [vmem:[#allocation10 + $0xa0] sm:$0xff] }
 0x2db   :  { %1686 = vmatprep.mubr.f32.mxu0 %v930_v22  ;;  %v1215_v22 = vld [vmem:[#allocation10 + $0x50] sm:$0xff]  ;;  %v1322_v47 = vld [vmem:[#allocation11] sm:$0xff] }
 0x2dc   :  { %1687 = vmatmul.mubr.f32.gmra.mrb[10].mxu0 %v932_v39  ;;  %v1798_v39 = vpack.c.bf16 %v1215_v22, %v1213_v31  ;;  %v1227_v31 = vld [vmem:[#allocation10 + $0xb0] sm:$0xff]  ;;  %v1230_v22 = vld [vmem:[#allocation10 + $0xc8] sm:$0xff] }
 0x2dd   :  { %v1812_v24 = vpack.c.bf16 %v1232_v40, %v1230_v22  ;;  %v1340_v40 = vld [vmem:[#allocation11 + $0x90] sm:$0xff] }
 0x2de   :  { %1799 = vmatpush1.bf16.msra.mxu1 %v1798_v39  ;;  %v1810_v39 = vpack.c.bf16 %v1227_v31, %v1225_v16  ;;  %v1341_v16 = vld [vmem:[#allocation11 + $0x98] sm:$0xff] }
 0x2df   :  { %1801 = vmatprep.subr.bf16.mxu1 %v1800_v0  ;;  %v1814_v0 = vpack.c.bf16 %v1231_v45, %v1229_v7  ;;  %v1824_v22 = vpack.c.bf16 %v1341_v16, %v1340_v40  ;;  %v1342_v7 = vld [vmem:[#allocation11 + $0xa0] sm:$0xff] }
 0x2e2   :  { %1803 = vmatpush1.bf16.msra.mxu1 %v1802_v46  ;;  %v1233_v46 = vld [vmem:[#allocation10 + $0xe0] sm:$0xff] }
 0x2e3   :  { %1805 = vmatprep.subr.bf16.mxu1 %v1804_v8  ;;  %v1818_v8 = vpack.c.bf16 %v1235_v21, %v1233_v46  ;;  %v1345_v46 = vld [vmem:[#allocation11 + $0xb8] sm:$0xff]  ;;  %v1328_v21 = vld [vmem:[#allocation11 + $0x30] sm:$0xff] }
 0x2e6   :  { %1807 = vmatpush1.bf16.msra.mxu1 %v1806_v55  ;;  %v1820_v55 = vpack.c.bf16 %v1339_v23, %v1338_v25  ;;  %v1346_v25 = vld [vmem:[#allocation11 + $0xc0] sm:$0xff]  ;;  %v1347_v23 = vld [vmem:[#allocation11 + $0xc8] sm:$0xff] }
 0x2e7   :  { %1809 = vmatprep.subr.bf16.mxu1 %v1808_v6  ;;  %v1323_v6 = vld [vmem:[#allocation11 + $0x8] sm:$0xff] }
 0x2e8   :  { %v1822_v31 = vpack.c.bf16 %v1323_v6, %v1322_v47  ;;  %1821 = vmatprep.subr.bf16.mxu0 %v1820_v55  ;;  %v1830_v47 = vpack.c.bf16 %v1327_v51, %v1326_v20  ;;  %v1836_v55 = vpack.c.bf16 %v1347_v23, %v1346_v25 }
 0x2ea   :  { %1811 = vmatpush1.bf16.msra.mxu1 %v1810_v39  ;;  %v1325_v39 = vld [vmem:[#allocation11 + $0x18] sm:$0xff]  ;;  %1823 = vmatpush3.bf16.msra.mxu0 %v1822_v31 }
 0x2eb   :  { %1813 = vmatprep.subr.bf16.mxu1 %v1812_v24  ;;  %v1343_v24 = vld [vmem:[#allocation11 + $0xa8] sm:$0xff]  ;;  %v1826_v45 = vpack.c.bf16 %v1325_v39, %v1324_v18  ;;  %1825 = vmatprep.subr.bf16.mxu0 %v1824_v22 }
 0x2ee   :  { %1815 = vmatpush1.bf16.msra.mxu1 %v1814_v0  ;;  %v1828_v0 = vpack.c.bf16 %v1343_v24, %v1342_v7  ;;  %1827 = vmatpush3.bf16.msra.mxu0 %v1826_v45 }
 0x2ef   :  { %1817 = vmatprep.subr.bf16.mxu1 %v1816_v3  ;;  %v1344_v3 = vld [vmem:[#allocation11 + $0xb0] sm:$0xff] }
 0x2f0   :  { %1829 = vmatprep.subr.bf16.mxu0 %v1828_v0  ;;  %v1832_v40 = vpack.c.bf16 %v1345_v46, %v1344_v3 }
 0x2f2   :  { %1819 = vmatpush1.bf16.msra.mxu1 %v1818_v8  ;;  %v1329_v8 = vld [vmem:[#allocation11 + $0x38] sm:$0xff]  ;;  %1831 = vmatpush3.bf16.msra.mxu0 %v1830_v47 }
 0x2f3   :  { %v1834_v16 = vpack.c.bf16 %v1329_v8, %v1328_v21  ;;  %1833 = vmatprep.subr.bf16.mxu0 %v1832_v40  ;;  %v1348_v21 = vld [vmem:[#allocation11 + $0xd0] sm:$0xff]  ;;  %v1333_v47 = vld [vmem:[#allocation11 + $0x58] sm:$0xff] }
 0x2f6   :  { %1835 = vmatpush3.bf16.msra.mxu0 %v1834_v16 }
 0x2f7   :  { %1837 = vmatprep.subr.bf16.mxu0 %v1836_v55 }
 0x354   :  { %v1679_v6 = vpop.f32.mrb[4].mxu0 }
 0x355   :  { %v1056_v31 = vmul.f32 %v1679_v6, %v2573_v13  ;;  %v1071_v18 = vmul.f32 %v1679_v6, %v2635_v54  ;;  %v1086_v22 = vmul.f32 %v1679_v6, %v2654_v9  ;;  %v1101_v39 = vmul.f32 %v1679_v6, %v2668_v28  ;;  %v1015_v7 = vpop.f32.mrb[5].mxu0 }
 0x356   :  { %v1116_v24 = vmul.f32 %v1679_v6, %v2698_v2  ;;  %v1131_v19 = vmul.f32 %v1679_v6, %v2715_v15  ;;  %v1146_v45 = vmul.f32 %v1679_v6, %v2758_v42  ;;  %v1161_v20 = vmul.f32 %v1679_v6, %v2742_v4  ;;  %v1330_v42 = vld [vmem:[#allocation11 + $0x40] sm:$0xff]  ;;  %v1331_v4 = vld [vmem:[#allocation11 + $0x48] sm:$0xff] }
 0x357   :  { %v1055_v51 = vmul.f32 %v1015_v7, %v2575_v14  ;;  %v1070_v0 = vmul.f32 %v1015_v7, %v2632_v52  ;;  %v1085_v13 = vmul.f32 %v1015_v7, %v2651_v5  ;;  %v1100_v54 = vmul.f32 %v1015_v7, %v2663_v17  ;;  %v1349_v5 = vld [vmem:[#allocation11 + $0xd8] sm:$0xff]  ;;  %v1351_v6 = vld [vmem:[#allocation11 + $0xe8] sm:$0xff] }
 0x358   :  { %v1115_v9 = vmul.f32 %v1015_v7, %v2665_v27  ;;  %v1130_v28 = vmul.f32 %v1015_v7, %v2712_v26  ;;  %v1145_v2 = vmul.f32 %v1015_v7, %v2726_v62  ;;  %v1160_v15 = vmul.f32 %v1015_v7, %v2779_v58  ;;  %v1332_v62 = vld [vmem:[#allocation11 + $0x50] sm:$0xff]  ;;  %v1350_v58 = vld [vmem:[#allocation11 + $0xe0] sm:$0xff] }
 0x359   :  { %v1057_v3 = vadd.f32 %v1056_v31, %v1055_v51  ;;  %v1072_v14 = vadd.f32 %v1071_v18, %v1070_v0  ;;  %v1087_v46 = vadd.f32 %v1086_v22, %v1085_v13  ;;  %v1102_v52 = vadd.f32 %v1101_v39, %v1100_v54 }
 0x35a   :  { %v1117_v8 = vadd.f32 %v1116_v24, %v1115_v9  ;;  %v1132_v17 = vadd.f32 %v1131_v19, %v1130_v28  ;;  %v1147_v25 = vadd.f32 %v1146_v45, %v1145_v2  ;;  %v1162_v23 = vadd.f32 %v1161_v20, %v1160_v15 }
 0x35b   :  { %v1838_v27 = vpack.c.bf16 %v1331_v4, %v1330_v42  ;;  %v1840_v26 = vpack.c.bf16 %v1349_v5, %v1348_v21  ;;  %v1842_v40 = vpack.c.bf16 %v1333_v47, %v1332_v62  ;;  %v1844_v31 = vpack.c.bf16 %v1351_v6, %v1350_v58  ;;  %v3030_v47 = vld [vmem:[#allocation29_spill] sm:$0xff]  ;;  %v3031_v58 = vld [vmem:[#allocation34_spill] sm:$0xff] }
 0x35d   :  { %1839 = vmatpush3.bf16.msra.mxu0 %v1838_v27 }
 0x35e   :  { %1841 = vmatprep.subr.bf16.mxu0 %v1840_v26 }
 0x361   :  { %1843 = vmatpush3.bf16.msra.mxu0 %v1842_v40 }
 0x362   :  { %1845 = vmatprep.subr.bf16.mxu0 %v1844_v31 }
 0x381   :  { %v1682_v18 = vpop.f32.mrb[6].mxu0 }
 0x382   :  { %v1060_v22 = vmul.f32 %v1682_v18, %v2594_v34  ;;  %v1075_v19 = vmul.f32 %v1682_v18, %v2642_v61  ;;  %v1090_v16 = vmul.f32 %v1682_v18, %v2691_v57  ;;  %v1105_v55 = vmul.f32 %v1682_v18, %v2677_v38  ;;  %v1025_v39 = vpop.f32.mrb[7].mxu0 }
 0x383   :  { %v1120_v7 = vmul.f32 %v1682_v18, %v2752_v32  ;;  %v1135_v24 = vmul.f32 %v1682_v18, %v2775_v35  ;;  %v1150_v45 = vmul.f32 %v1682_v18, %v2766_v59  ;;  %v1165_v20 = vmul.f32 %v1682_v18, %v2787_v1 }
 0x384   :  { %v1058_v51 = vmul.f32 %v1025_v39, %v2586_v29  ;;  %v1073_v0 = vmul.f32 %v1025_v39, %v2644_v63  ;;  %v1088_v34 = vmul.f32 %v1025_v39, %v2681_v41  ;;  %v1103_v61 = vmul.f32 %v1025_v39, %v2660_v12 }
 0x385   :  { %v1118_v57 = vmul.f32 %v1025_v39, %v2728_v49  ;;  %v1133_v38 = vmul.f32 %v1025_v39, %v2740_v60  ;;  %v1148_v32 = vmul.f32 %v1025_v39, %v2750_v48  ;;  %v1163_v35 = vmul.f32 %v1025_v39, %v2756_v37 }
 0x386   :  { %v1059_v13 = vadd.f32 %v1058_v51, %v1057_v3  ;;  %v1074_v59 = vadd.f32 %v1073_v0, %v1072_v14  ;;  %v1089_v54 = vadd.f32 %v1088_v34, %v1087_v46  ;;  %v1104_v1 = vadd.f32 %v1103_v61, %v1102_v52  ;;  %v3033_v34 = vld [vmem:[#allocation21_spill] sm:$0xff] }
 0x387   :  { %v1119_v9 = vadd.f32 %v1118_v57, %v1117_v8  ;;  %v1134_v29 = vadd.f32 %v1133_v38, %v1132_v17  ;;  %v1149_v28 = vadd.f32 %v1148_v32, %v1147_v25  ;;  %v1164_v63 = vadd.f32 %v1163_v35, %v1162_v23  ;;  %v3027_v23 = vld [vmem:[#allocation23_spill] sm:$0xff]  ;;  %v3034_v61 = vld [vmem:[#allocation25_spill] sm:$0xff]  ;;  %v3035_v38 = vld [vmem:[#allocation30_spill] sm:$0xff] }
 0x388   :  { %v1061_v2 = vadd.f32 %v1060_v22, %v1059_v13  ;;  %v1076_v41 = vadd.f32 %v1075_v19, %v1074_v59  ;;  %v1091_v15 = vadd.f32 %v1090_v16, %v1089_v54  ;;  %v1106_v12 = vadd.f32 %v1105_v55, %v1104_v1  ;;  %v3036_v35 = vld [vmem:[#allocation31_spill] sm:$0xff]  ;;  %v3037_v54 = vld [vmem:[#allocation36_spill] sm:$0xff] }
 0x389   :  { %v1121_v42 = vadd.f32 %v1120_v7, %v1119_v9  ;;  %v1136_v49 = vadd.f32 %v1135_v24, %v1134_v29  ;;  %v1151_v4 = vadd.f32 %v1150_v45, %v1149_v28  ;;  %v1166_v60 = vadd.f32 %v1165_v20, %v1164_v63  ;;  %v3032_v45 = vld [vmem:[#allocation38_spill] sm:$0xff]  ;;  %v3038_v9 = vld [vmem:[#allocation20_spill] sm:$0xff] }
 0x38a   :  { %v3039_v28 = vld [vmem:[#allocation22_spill] sm:$0xff] }
 0x39f   :  { %v1685_v21 = vpop.f32.mrb[8].mxu0 }
 0x3a0   :  { %v1064_v48 = vmul.f32 %v1685_v21, %v2604_v43  ;;  %v1079_v37 = vmul.f32 %v1685_v21, %v2705_v10  ;;  %v1094_v3 = vmul.f32 %v1685_v21, %v2746_v11  ;;  %v1109_v14 = vmul.f32 %v1685_v21, %v2732_v53  ;;  %v1035_v46 = vpop.f32.mrb[9].mxu0  ;;  %v3028_v43 = vld [vmem:[#allocation24_spill] sm:$0xff]  ;;  %v3029_v10 = vld [vmem:[#allocation27_spill] sm:$0xff] }
 0x3a1   :  { %v1124_v52 = vmul.f32 %v1685_v21, %v2811_v36  ;;  %v1139_v5 = vmul.f32 %v1685_v21, %v2822_v44  ;;  %v1154_v8 = vmul.f32 %v1685_v21, %v2831_v56  ;;  %v1062_v17 = vmul.f32 %v1035_v46, %v2588_v30 }
 0x3a2   :  { %v1077_v25 = vmul.f32 %v1035_v46, %v2686_v50  ;;  %v1092_v27 = vmul.f32 %v1035_v46, %v3027_v23  ;;  %v1107_v26 = vmul.f32 %v1035_v46, %v3028_v43  ;;  %v1122_v62 = vmul.f32 %v1035_v46, %v3029_v10  ;;  %v3046_v23 = vld [vmem:[#allocation41_spill] sm:$0xff] }
 0x3a3   :  { %v1063_v11 = vadd.f32 %v1062_v17, %v1061_v2  ;;  %v1137_v53 = vmul.f32 %v1035_v46, %v3030_v47  ;;  %v1152_v6 = vmul.f32 %v1035_v46, %v3031_v58  ;;  %v1167_v36 = vmul.f32 %v1035_v46, %v2845_v33  ;;  %v3040_v2 = vld [vmem:[#allocation26_spill] sm:$0xff]  ;;  %v3045_v46 = vld [vmem:[#allocation35_spill] sm:$0xff]  ;;  %v3047_v58 = vld [vmem:[#allocation40_spill] sm:$0xff] }
 0x3a4   :  { %v1078_v44 = vadd.f32 %v1077_v25, %v1076_v41  ;;  %v1093_v40 = vadd.f32 %v1092_v27, %v1091_v15  ;;  %v1108_v56 = vadd.f32 %v1107_v26, %v1106_v12  ;;  %v1123_v31 = vadd.f32 %v1122_v62, %v1121_v42  ;;  %v3041_v15 = vld [vmem:[#allocation28_spill] sm:$0xff]  ;;  %v3042_v42 = vld [vmem:[#allocation33_spill] sm:$0xff] }
 0x3a5   :  { %v1138_v30 = vadd.f32 %v1137_v53, %v1136_v49  ;;  %v1065_v18 = vadd.f32 %v1064_v48, %v1063_v11  ;;  %v1153_v50 = vadd.f32 %v1152_v6, %v1151_v4  ;;  %v1168_v22 = vadd.f32 %v1167_v36, %v1166_v60  ;;  %v3043_v4 = vld [vmem:[#allocation32_spill] sm:$0xff] }
 0x3a6   :  { %v1080_v19 = vadd.f32 %v1079_v37, %v1078_v44  ;;  %v1095_v16 = vadd.f32 %v1094_v3, %v1093_v40  ;;  %v1110_v55 = vadd.f32 %v1109_v14, %v1108_v56  ;;  %v1125_v39 = vadd.f32 %v1124_v52, %v1123_v31  ;;  %v3048_v31 = vld [vmem:[#allocation39_spill] sm:$0xff] }
 0x3a7   :  { %v1140_v7 = vadd.f32 %v1139_v5, %v1138_v30  ;;  %v1155_v24 = vadd.f32 %v1154_v8, %v1153_v50  ;;  %v1169_v20 = vmul.f32 %v1685_v21, %v3032_v45  ;;  %v3044_v21 = vld [vmem:[#allocation37_spill] sm:$0xff] }
 0x3a8   :  { %v1566_v8 = vld [vmem:[%s2974_s5] ss:$0 sm:$0xff] }
 0x3a9   :  { %v1170_v51 = vadd.f32 %v1169_v20, %v1168_v22 }
 0x3af   :  { %v1688_v0 = vpop.f32.mrb[10].mxu0 }
 0x3b0   :  { %v1068_v33 = vmul.f32 %v1688_v0, %v3033_v34  ;;  %v1083_v57 = vmul.f32 %v1688_v0, %v3034_v61  ;;  %v1098_v32 = vmul.f32 %v1688_v0, %v3035_v38  ;;  %v1113_v13 = vmul.f32 %v1688_v0, %v3036_v35  ;;  %v1045_v59 = vpop.f32.mrb[11].mxu0 }
 0x3b1   :  { %v1128_v1 = vmul.f32 %v1688_v0, %v3037_v54  ;;  %v1066_v29 = vmul.f32 %v1045_v59, %v3038_v9  ;;  %v1081_v63 = vmul.f32 %v1045_v59, %v3039_v28  ;;  %v1096_v41 = vmul.f32 %v1045_v59, %v3040_v2  ;;  %v1335_v9 = vld [vmem:[#allocation11 + $0x68] sm:$0xff]  ;;  %v1352_v28 = vld [vmem:[#allocation11 + $0xf0] sm:$0xff] }
 0x3b2   :  { %v1111_v12 = vmul.f32 %v1045_v59, %v3041_v15  ;;  %v1126_v49 = vmul.f32 %v1045_v59, %v3042_v42  ;;  %v1141_v60 = vmul.f32 %v1045_v59, %v3043_v4  ;;  %v1143_v48 = vmul.f32 %v1688_v0, %v3044_v21  ;;  %v1336_v2 = vld [vmem:[#allocation11 + $0x70] sm:$0xff]  ;;  %v1337_v15 = vld [vmem:[#allocation11 + $0x78] sm:$0xff]  ;;  %v1432_v42 = vld [vmem:[#allocation13] sm:$0xff] }
 0x3b3   :  { %v1067_v37 = vadd.f32 %v1066_v29, %v1065_v18  ;;  %v1082_v3 = vadd.f32 %v1081_v63, %v1080_v19  ;;  %v1097_v14 = vadd.f32 %v1096_v41, %v1095_v16  ;;  %v1156_v52 = vmul.f32 %v1045_v59, %v3045_v46  ;;  %v1353_v63 = vld [vmem:[#allocation11 + $0xf8] sm:$0xff]  ;;  %v1434_v4 = vld [vmem:[#allocation13 + $0x10] sm:$0xff] }
 0x3b4   :  { %v1112_v5 = vadd.f32 %v1111_v12, %v1110_v55  ;;  %v1127_v17 = vadd.f32 %v1126_v49, %v1125_v39  ;;  %v1142_v25 = vadd.f32 %v1141_v60, %v1140_v7  ;;  %v1158_v27 = vmul.f32 %v1688_v0, %v3046_v23  ;;  %v1433_v49 = vld [vmem:[#allocation13 + $0x8] sm:$0xff] }
 0x3b5   :  { %v1069_v43 = vadd.f32 %v1068_v33, %v1067_v37  ;;  %v1084_v26 = vadd.f32 %v1083_v57, %v1082_v3  ;;  %v1099_v10 = vadd.f32 %v1098_v32, %v1097_v14  ;;  %v1157_v62 = vadd.f32 %v1156_v52, %v1155_v24  ;;  %v1436_v3 = vld [vmem:[#allocation13 + $0x20] sm:$0xff]  ;;  %v1437_v14 = vld [vmem:[#allocation13 + $0x28] sm:$0xff]  ;;  %v1438_v52 = vld [vmem:[#allocation13 + $0x30] sm:$0xff] }
 0x3b6   :  { %v1114_v11 = vadd.f32 %v1113_v13, %v1112_v5  ;;  %v1129_v47 = vadd.f32 %v1128_v1, %v1127_v17  ;;  %v1144_v53 = vadd.f32 %v1143_v48, %v1142_v25  ;;  %v1171_v6 = vmul.f32 %v1045_v59, %v3047_v58  ;;  %v1334_v1 = vld [vmem:[#allocation11 + $0x60] sm:$0xff]  ;;  %v1435_v48 = vld [vmem:[#allocation13 + $0x18] sm:$0xff]  ;;  %v1441_v25 = vld [vmem:[#allocation13 + $0x48] sm:$0xff] }
 0x3b7   :  { %v1159_v36 = vadd.f32 %v1158_v27, %v1157_v62  ;;  %v1181_v44 = vadd.f32 %v1566_v8, %v1069_v43  ;;  %v1183_v40 = vadd.f32 %v1566_v8, %v1084_v26  ;;  %v1173_v30 = vmul.f32 %v1688_v0, %v3048_v31  ;;  %v1439_v5 = vld [vmem:[#allocation13 + $0x38] sm:$0xff]  ;;  %v1440_v17 = vld [vmem:[#allocation13 + $0x40] sm:$0xff]  ;;  %v1442_v27 = vld [vmem:[#allocation13 + $0x50] sm:$0xff] }
 0x3b8   :  { %v1172_v56 = vadd.f32 %v1171_v6, %v1170_v51  ;;  %v1185_v18 = vadd.f32 %v1566_v8, %v1099_v10  ;;  %v1187_v19 = vadd.f32 %v1566_v8, %v1114_v11  ;;  %v1189_v39 = vadd.f32 %v1566_v8, %v1129_v47  ;;  %v1443_v43 = vld [vmem:[#allocation13 + $0x58] sm:$0xff]  ;;  %v1237_v47 = vld [vmem:[%s2976_s7] sm:$0x3] }
 0x3b9   :  { %v1182_v50 = vmax.f32 %v1181_v44, 0.0  ;;  %v1184_v22 = vmax.f32 %v1183_v40, 0.0  ;;  %v1191_v45 = vadd.f32 %v1566_v8, %v1144_v53  ;;  %v1193_v33 = vadd.f32 %v1566_v8, %v1159_v36 }
 0x3ba   :  { %v1174_v16 = vadd.f32 %v1173_v30, %v1172_v56  ;;  %v1186_v55 = vmax.f32 %v1185_v18, 0.0  ;;  %v1188_v24 = vmax.f32 %v1187_v19, 0.0  ;;  %v1190_v34 = vmax.f32 %v1189_v39, 0.0  ;;  %v1444_v18 = vld [vmem:[#allocation13 + $0x60] sm:$0xff]  ;;  %v1446_v19 = vld [vmem:[#allocation13 + $0x70] sm:$0xff] }
 0x3bb   :  { %v1197_v7 = vadd.f32 %v1184_v22, %v1182_v50  ;;  %v1192_v57 = vmax.f32 %v1191_v45, 0.0  ;;  %v1194_v51 = vmax.f32 %v1193_v33, 0.0  ;;  %v1846_v29 = vpack.c.bf16 %v1335_v9, %v1334_v1  ;;  %v1445_v50 = vld [vmem:[#allocation13 + $0x68] sm:$0xff] }
 0x3bc   :  { %v1195_v38 = vadd.f32 %v1566_v8, %v1174_v16  ;;  %v1848_v41 = vpack.c.bf16 %v1353_v63, %v1352_v28  ;;  %v1850_v12 = vpack.c.bf16 %v1337_v15, %v1336_v2  ;;  %v2319_v60 = vmov 0.0|0.0   ;;  %v1447_v16 = vld [vmem:[#allocation13 + $0x78] sm:$0xff] }
 0x3bd   :  { %v1198_v20 = vadd.f32 %v1197_v7, %v1186_v55  ;;  %1847 = vmatpush3.bf16.msra.mxu0 %v1846_v29  ;;  %1852 = vmatprep.subr.bf16.mxu1 %v2319_v60  ;;  %v1853_v21 = vpack.c.bf16 %v1433_v49, %v1432_v42  ;;  %v1856_v37 = vpack.c.bf16 %v1435_v48, %v1434_v4  ;;  %v1239_v10 = vlaneseq }
 0x3be   :  { %v1196_v0 = vmax.f32 %v1195_v38, 0.0  ;;  %1849 = vmatprep.subr.bf16.mxu0 %v1848_v41  ;;  %v1859_v46 = vpack.c.bf16 %v1437_v14, %v1436_v3  ;;  %v1862_v8 = vpack.c.bf16 %v1439_v5, %v1438_v52  ;;  %v1865_v23 = vpack.c.bf16 %v1441_v25, %v1440_v17 }
 0x3bf   :  { %v1199_v61 = vadd.f32 %v1198_v20, %v1188_v24  ;;  %v1868_v26 = vpack.c.bf16 %v1443_v43, %v1442_v27  ;;  %v1240_v62 = vshrl.u32 %v1239_v10, 7  ;;  %v1871_v22 = vpack.c.bf16 %v1445_v50, %v1444_v18  ;;  %v1567_v24 = vld [vmem:[%s2978_s9] ss:$0 sm:$0xff]  ;;  %s2321_s9 = smov [#allocation14]  }
 0x3c0   :  { %v3049_v55 = vmov 0.0   ;;  %v1874_v39 = vpack.c.bf16 %v1447_v16, %v1446_v19 }
 0x3c1   :  { %v1200_v32 = vadd.f32 %v1199_v61, %v1190_v34  ;;  %1851 = vmatpush3.bf16.msra.mxu0 %v1850_v12  ;;  %v1241_v11 = vsub.s32 0, %v1240_v62  ;;  %v1245_v53 = vsub.s32 1, %v1240_v62  ;;  %v1526_v61 = vand.u32 127, %v1239_v10 }
 0x3c3   :  { %v1201_v35 = vadd.f32 %v1200_v32, %v1192_v57  ;;  %v1242_v58 = vrot.slane %v1237_v47, %v1241_v11  ;;  %v1246_v6 = vrot.slane %v1237_v47, %v1245_v53  ;;  %v1568_v57 = vld [vmem:[%s2980_s11] ss:$0 sm:$0xff]  ;;  %vm1527_vm3 = vcmp.lt.s32.totalorder %v1526_v61, 8  ;;  %s1549_s11 = sshll.u32 %s2321_s9, 4  ;;  %s1550_s11 = int_to_ptr.vmem [resolvable:$true] %s1549_s11 }
 0x3c4   :  { %vm1539_vm4 = vcmp.eq.s32.totalorder %v1526_v61, 8  ;;  %s2202_s25 = scalar_lea.vmem %s1550_s11, 128  ;;  %p2207_p1 = scmp.lt.s32.totalorder %s1550_s11, %s1550_s11 }
 0x3c5   :  { %v1202_v13 = vadd.f32 %v1201_v35, %v1194_v51  ;;  %p2203_p0 = scmp.ne.s32.totalorder %s1550_s11, %s2202_s25  ;;  %p2208_p2 = scmp.lt.s32.totalorder %s2202_s25, %s2202_s25 }
 0x3c7   :  { %v1203_v59 = vadd.f32 %v1202_v13, %v1196_v0  ;;  %p2209_p3 = por %p2208_p2, %p2207_p1 }
 0x3c9   :  { %v1204_v54 = vmul.f32 0.125, %v1203_v59  ;;  %p2210_p4 = pnand %p2209_p3, %p2203_p0 }
 0x3cb   :  { %1314 = vmatmul.mubr.f32.vlgmr.msra.gmra.mrb[4].mxu1 %v1204_v54 }
 0x3cc   :  { %1854 = vmatpush3.bf16.msra.mxu1 %v1853_v21  ;;  %1721 = vmatprep.mubr.msk.f32.mxu1 %vm2320_vm2, %v3049_v55 }
 0x3cd   :  { %1855 = vmatprep.subr.bf16.mxu1 %v2319_v60 }
 0x3d0   :  { %1857 = vmatpush3.bf16.msra.mxu1 %v1856_v37 }
 0x3d1   :  { %1858 = vmatprep.subr.bf16.mxu1 %v2319_v60 }
 0x3d4   :  { %1860 = vmatpush3.bf16.msra.mxu1 %v1859_v46 }
 0x3d5   :  { %1861 = vmatprep.subr.bf16.mxu1 %v2319_v60 }
 0x3d8   :  { %1863 = vmatpush3.bf16.msra.mxu1 %v1862_v8 }
 0x3d9   :  { %1864 = vmatprep.subr.bf16.mxu1 %v2319_v60 }
 0x3dc   :  { %1866 = vmatpush3.bf16.msra.mxu1 %v1865_v23 }
 0x3dd   :  { %1867 = vmatprep.subr.bf16.mxu1 %v2319_v60 }
 0x3e0   :  { %1869 = vmatpush3.bf16.msra.mxu1 %v1868_v26 }
 0x3e1   :  { %1870 = vmatprep.subr.bf16.mxu1 %v2319_v60 }
 0x3e4   :  { %1872 = vmatpush3.bf16.msra.mxu1 %v1871_v22 }
 0x3e5   :  { %1873 = vmatprep.subr.bf16.mxu1 %v2319_v60 }
 0x3e8   :  { %1875 = vmatpush3.bf16.msra.mxu1 %v1874_v39 }
 0x49e   :  { %v1315_v36 = vpop.f32.mrb[4].mxu1 }
 0x49f   :  { %v1316_v44 = vadd.f32 %v1315_v36, %v1242_v58  ;;  %v1317_v40 = vpop.f32.mrb[5].mxu1 }
 0x4a0   :  { %v1318_v56 = vadd.f32 %v1317_v40, %v1246_v6 }
 0x4a1   :  { %v1320_v30 = vmax.f32 %v1316_v44, 0.0 }
 0x4a2   :  { %v1321_v31 = vmax.f32 %v1318_v56, 0.0 }
 0x4a4   :  { %1425 = vmatprep.mubr.f32.mxu0 %v1321_v31 }
 0x4a5   :  { %1426 = vmatmul.mubr.f32.vlgmr.msra.gmra.mrb[12].mxu0 %v1320_v30 }
 0x578   :  { %v1625_v7 = vpop.f32.mrb[12].mxu0 }
 0x579   :  { %v1626_v45 = vpop.f32.mrb[13].mxu0 }
 0x57a   :  { %v1627_v20 = vadd.f32 %v1626_v45, %v1625_v7 }
 0x57c   :  { %v1428_v34 = vadd.f32 %v1627_v20, %v1567_v24 }
 0x57e   :  { %v1431_v33 = vmax.f32 %v1428_v34, 0.0 }
 0x580   :  { %1722 = vmatmul.mubr.f32.vlgmr.msra.gmra.mrb[6].mxu1 %v1431_v33 }
 0x653   :  { %v1521_v38 = vpop.f32.mrb[6].mxu1 }
 0x654   :  { %v1522_v32 = vadd.f32 %v1568_v57, %v1521_v38  ;;  %v1723_v51 = vpop.f32.mrb[7].mxu1 }
 0x656   :  { %v1528_v35 = vsel %vm1527_vm3, %v1522_v32, -inf  ;;  %v1540_v63 = vsel %vm1539_vm4, %v1522_v32, 0.0 }
 0x657   :  { %1529 = vmax.xlane.f32.xlu1 %v1528_v35 }
 0x6e4   :  { %v1530_v0 = vpop.xlane.xlu1 %1529 }
 0x6e5   :  { %v1531_v13 = vsub.f32 %v1522_v32, %v1530_v0 }
 0x6e7   :  { %v1532_v59 = vsel %vm1527_vm3, %v1531_v13, -inf }
 0x6e8   :  { %v1533_v54 = vmul.f32 1.442695, %v1532_v59 }
 0x6ea   :  { %2044 = vpow2.f32 %v1533_v54 }
 0x6f4   :  { %v2045_v1 = vpop.eup %2044 }
 0x6f5   :  { %1535 = vadd.xlane.f32.xlu0 %v2045_v1 }
 0x782   :  { %v1536_v9 = vpop.xlane.xlu0 %1535 }
 0x783   :  { %2046 = vrcp.f32 %v1536_v9 }
 0x78d   :  { %v2047_v29 = vpop.eup %2046 }
 0x78e   :  { %v1538_v28 = vmul.f32 %v2047_v29, %v2045_v1 }
 0x790   :  { %v1541_v2 = vsel %vm1527_vm3, %v1538_v28, %v1540_v63 }
 0x791   :  { %1542 = vst [vmem:[#allocation14] sm:$0xff] %v1541_v2 }
 0x792   :  { %2213 = shalt.err (!%p2210_p4)
}
 0x793   :  { %s2214_s14 = scalar_lea.hbm %s2981_s12, 128 }
 0x794   :  { %p2215_p5 = scmp.ne.s32.totalorder %s2981_s12, %s2214_s14  ;;  %p2218_p6 = scmp.lt.u32.totalorder %s2214_s14, %s2981_s12 }
 0x796   :  { %p2220_p7 = pnand %p2218_p6, %p2215_p5 }
 0x798   :  { %2223 = shalt.err (!%p2220_p7)
}
 0x799   :  { %1552 = dma.vmem_to_hbm [thread:$0]  %s1550_s11, 128, %s2981_s12, [#allocation4]  }
 0x79a   :  { %2232 = dma.done.wait [#allocation4], 128  }
 0x79b   :  { %2233 = vsyncadd [#allocation4], 4294967168 }
 0x79c   :  { %1556 = vsyncpa [#allocation3], 1 }
 0x79d   :  { %1557 = vsyncpa [#allocation6], 1 }
 0x79e   :  { %1558 = vsyncpa [#allocation9], 1 }
 0x79f   :  { %1559 = vsyncpa [#allocation12], 1 }
 0x7a0   :  { %1560 = vsyncpa [#allocation4], 1 }

</bundles_post_ra>
